<compile_context>
chip_gen: v7x
topology: tpu7x:2x2x1
jax: 0.10.0
libtpu: 0.0.40
codegen_flags: <defaults>
</compile_context>

<pallas_src>
import jax
import jax.numpy as jnp
from jax.experimental import pallas as pl
from jax.experimental.pallas import tpu as pltpu


def _round_up(x, m):
    return ((x + m - 1) // m) * m


def _vmem_capacity_bytes():
    try:
        return int(pltpu.get_tpu_info().vmem_capacity_bytes)
    except Exception:
        return 64 * 1024 * 1024        # conservative default (v7x per-core VMEM)


# --------------------------------------------------------------------------
# Conv path: fused 3x3 stride-2 conv as 6 K-stacked MXU matmuls + bias.
# --------------------------------------------------------------------------
def _conv3x3s2_kernel(x0_ref, x1_ref, wa_ref, wb_ref, b_ref, o_ref):
    # x0_ref/x1_ref : (Ho+1, Wk+1, 2*Cin)  row-parity strips of the padded input; the column
    #                 parity is folded into the channel (last) dim.
    # wa_ref        : (3, 2*Cin, TCout)    taps (kh=i, kw=0) and (kh=i, kw=1), K-stacked.
    # wb_ref        : (3,   Cin, TCout)    taps (kh=i, kw=2).
    # b_ref         : (1, TCout)
    # o_ref         : (Ho, Wk, TCout)
    Ho, Wk, TCout = o_ref.shape
    K2 = wa_ref.shape[1]                  # 2 * Cin
    Cin = wb_ref.shape[1]
    phases = (x0_ref, x1_ref)

    acc = jnp.zeros((Ho * Wk, TCout), jnp.float32)
    for i in range(3):                    # unrolled -> 6 MXU matmuls (was 9 small-K ones)
        a, di = i % 2, i // 2
        ph = phases[a]
        # kw=0 and kw=1 taps: adjacent in the last dim, so one contiguous K=2*Cin operand.
        # Column-0-aligned slice + Wk % 8 == 0 makes the (Ho,Wk,K)->(Ho*Wk,K) collapse a
        # tile relabel (no relayout).
        lhs01 = ph[di:di + Ho, 0:Wk, :]
        acc = acc + jnp.dot(lhs01.reshape(Ho * Wk, K2), wa_ref[i],
                            preferred_element_type=jnp.float32)
        # kw=2 tap: same even column parity shifted one output column; the off-by-one
        # sublane offset costs one small relayout per kernel row (3 total per grid step).
        lhs2 = ph[di:di + Ho, 1:Wk + 1, 0:Cin]
        acc = acc + jnp.dot(lhs2.reshape(Ho * Wk, Cin), wb_ref[i],
                            preferred_element_type=jnp.float32)
    acc = acc + b_ref[...].astype(jnp.float32)
    o_ref[...] = acc.reshape(Ho, Wk, TCout).astype(o_ref.dtype)


def _conv_pallas_call(xr, wa, wb, b_k, *, N, Ho, Wk, Cin, Cout, TCout,
                      out_dtype, vmem_limit, phase_buffer_count):
    n_co = Cout // TCout
    phase_shape = (None, Ho + 1, None, Wk + 1, 2 * Cin)

    def phase_spec(a):
        imap = lambda n, co, a=a: (n, 0, a, 0, 0)
        if phase_buffer_count is not None:
            try:
                return pl.BlockSpec(phase_shape, imap,
                                    pipeline_mode=pl.Buffered(phase_buffer_count))
            except Exception:          # pipeline_mode unsupported -> default buffering
                pass
        return pl.BlockSpec(phase_shape, imap)

    return pl.pallas_call(
        _conv3x3s2_kernel,
        out_shape=jax.ShapeDtypeStruct((N, Ho, Wk, Cout), out_dtype),
        grid=(N, n_co),
        in_specs=[
            phase_spec(0), phase_spec(1),
            pl.BlockSpec((3, 2 * Cin, TCout), lambda n, co: (0, 0, co)),
            pl.BlockSpec((3, Cin, TCout), lambda n, co: (0, 0, co)),
            pl.BlockSpec((1, TCout), lambda n, co: (0, co)),
        ],
        out_specs=pl.BlockSpec((None, Ho, Wk, TCout), lambda n, co: (n, 0, 0, co)),
        compiler_params=pltpu.CompilerParams(
            dimension_semantics=("parallel", "parallel"),
            vmem_limit_bytes=int(vmem_limit)),
    )(xr, xr, wa, wb, b_k)


def _conv2d_s2_p1(x_nchw, w_oihw, bias):
    """3x3 stride-2 pad-1 conv, NCHW in / NCHW out (PyTorch layout)."""
    N, Cin, H, W = x_nchw.shape
    Cout = w_oihw.shape[0]
    Ho = (H - 1) // 2 + 1
    Wo = (W - 1) // 2 + 1
    Wk = max(8, _round_up(Wo, 8))          # sublane-friendly padded output width

    # One transpose+pad pass (fuses into a single HBM pass under the caller's jit).  The
    # phase "split" below is a FREE contiguous reshape — the kernel DMAs the two row-parity
    # strips straight out of it (no extra HBM pass, unlike v2's explicit strided slices).
    x_nhwc = jnp.transpose(x_nchw, (0, 2, 3, 1))
    Hp, Wp = 2 * (Ho + 1), 2 * (Wk + 1)
    xp = jnp.pad(x_nhwc, ((0, 0), (1, Hp - H - 1), (1, Wp - W - 1), (0, 0)))
    xr = xp.reshape(N, Ho + 1, 2, Wk + 1, 2 * Cin)       # free (contiguous) reshape

    # Weights: (O,I,Kh,Kw) -> (Kh,Kw,Cin,Cout); K-stack the kw=0/kw=1 taps.
    w_k = jnp.transpose(w_oihw, (2, 3, 1, 0)).astype(x_nchw.dtype)
    wa = w_k[:, 0:2].reshape(3, 2 * Cin, Cout)           # K order = (col parity, cin)
    wb = w_k[:, 2]                                       # (3, Cin, Cout)
    b_k = bias.reshape(1, Cout).astype(jnp.float32)

    # Cout tile: 512 where the VMEM budget allows (v5e/v6e: 128 MiB), 256 otherwise (v7x: 64).
    vmem_cap = _vmem_capacity_bytes()
    if Cout > 512 and Cout % 512 == 0 and vmem_cap >= 100 * 1024 * 1024:
        TCout = 512
    elif Cout > 256 and Cout % 256 == 0:
        TCout = 256
    else:
        TCout = Cout
    n_co = Cout // TCout

    # VMEM limit computed from the actual block shapes (+ headroom), capped at 3/4 physical.
    itemsize = x_nchw.dtype.itemsize
    phase_bytes = (Ho + 1) * (Wk + 1) * 2 * Cin * itemsize
    w_bytes = (3 * 2 * Cin + 3 * Cin) * TCout * itemsize + TCout * 4
    out_bytes = Ho * Wk * TCout * itemsize
    acc_bytes = Ho * Wk * TCout * 4
    phase_bufs = 1 if n_co > 1 else 2
    est = 2 * phase_bytes * phase_bufs + 2 * w_bytes + 2 * out_bytes + acc_bytes
    vmem_limit = max(32 * 1024 * 1024, int(est * 1.25) + (2 << 20))
    vmem_limit = min(vmem_limit, (vmem_cap * 3) // 4, 128 * 1024 * 1024)
    # TODO(synk): Ho (row) tiling with a one-row halo so phase blocks are image-size
    # independent; required for very large images on v7x's 64 MiB VMEM.

    kwargs = dict(N=N, Ho=Ho, Wk=Wk, Cin=Cin, Cout=Cout, TCout=TCout,
                  out_dtype=x_nchw.dtype, vmem_limit=vmem_limit)
    try:
        # Phase strips are revisited along the inner Cout axis (block index constant in co),
        # so single-buffer them when Cout is tiled — halves their VMEM footprint.
        y = _conv_pallas_call(xr, wa, wb, b_k,
                              phase_buffer_count=1 if n_co > 1 else None, **kwargs)
    except Exception:
        y = _conv_pallas_call(xr, wa, wb, b_k, phase_buffer_count=None, **kwargs)

    y = y[:, :, :Wo, :]                        # drop the Wk padding columns
    return jnp.transpose(y, (0, 3, 1, 2))      # NHWC -> NCHW


# --------------------------------------------------------------------------
# Avg-pool path: fused 2x2/stride-2 average pool, one HBM read + one HBM write.
# --------------------------------------------------------------------------
def _pool2x2_kernel(x_ref, pmat_ref, o_ref):
    # x_ref    : (2*TR, 2*Wo)  interleaved even/odd input rows (one window row-pair per out row)
    # pmat_ref : (2*Wo, Wo)    0.25-valued column-pair compaction matrix
    # o_ref    : (TR, Wo)
    TR = o_ref.shape[0]
    top = x_ref[pl.ds(0, TR, 2), :]            # even input rows (sublane-strided load)
    bot = x_ref[pl.ds(1, TR, 2), :]            # odd input rows
    s = top + bot                              # row-pair sum (VPU)
    # Column-pair sum + 0.25 scale as one tiny matmul on the otherwise idle MXU; the op
    # stays HBM-bound, and this avoids any lane shuffling on the VPU/XLU.
    o_ref[...] = jnp.dot(s, pmat_ref[...],
                         preferred_element_type=jnp.float32).astype(o_ref.dtype)


def _pool4_kernel(a_ref, b_ref, c_ref, d_ref, o_ref):
    # Fallback kernel (known-good): pure VPU add of the four pre-split window phases.
    o_ref[...] = ((a_ref[...] + b_ref[...]) + (c_ref[...] + d_ref[...])) * 0.25


def _avg_pool2x2(x_nchw):
    """2x2 stride-2 average pool (AvgPool2d(2, 2) floor behaviour), NCHW."""
    N, C, H, W = x_nchw.shape
    Ho, Wo = H // 2, W // 2
    xe = x_nchw[:, :, :2 * Ho, :2 * Wo]        # no-op for even H, W
    R, W2 = N * C * Ho, 2 * Wo
    x2d = xe.reshape(2 * R, W2)                # free reshape: rows 2r/2r+1 form one window pair

    # Row-tile size: big lane-dense blocks toward the HBM roofline; >=2 grid steps when the
    # problem is large enough so both v7x TensorCores get work.
    itemsize = x_nchw.dtype.itemsize
    bytes_per_out_row = (2 * W2 + Wo) * itemsize
    cap = max(8, ((8 << 20) // max(bytes_per_out_row, 1)) // 8 * 8)
    if R <= 1024:
        TR = R
    else:
        TR = min(cap, _round_up((R + 1) // 2, 8))
    grid_r = pl.cdiv(R, TR)

    pmat = (0.25 * jnp.repeat(jnp.eye(Wo, dtype=jnp.float32), 2, axis=0)
            ).astype(x_nchw.dtype)             # (2*Wo, Wo); exact in bf16/f32

    def call_fused():
        return pl.pallas_call(
            _pool2x2_kernel,
            out_shape=jax.ShapeDtypeStruct((R, Wo), x_nchw.dtype),
            grid=(grid_r,),
            in_specs=[
                pl.BlockSpec((2 * TR, W2), lambda i: (i, 0)),
                pl.BlockSpec((W2, Wo), lambda i: (0, 0)),
            ],
            out_specs=pl.BlockSpec((TR, Wo), lambda i: (i, 0)),
            compiler_params=pltpu.CompilerParams(
                dimension_semantics=("parallel",),
                vmem_limit_bytes=40 * 1024 * 1024),
        )(x2d, pmat)

    def call_fallback():
        # v2-style path (one extra HBM pass to split the phases); only used if the fused
        # kernel's strided sublane loads fail to lower on this jax/libtpu version.
        a = xe[:, :, 0::2, 0::2].reshape(R, Wo)
        b = xe[:, :, 0::2, 1::2].reshape(R, Wo)
        c = xe[:, :, 1::2, 0::2].reshape(R, Wo)
        d = xe[:, :, 1::2, 1::2].reshape(R, Wo)
        spec = pl.BlockSpec((TR, Wo), lambda i: (i, 0))
        return pl.pallas_call(
            _pool4_kernel,
            out_shape=jax.ShapeDtypeStruct((R, Wo), x_nchw.dtype),
            grid=(grid_r,),
            in_specs=[spec] * 4,
            out_specs=spec,
            compiler_params=pltpu.CompilerParams(
                dimension_semantics=("parallel",)),
        )(a, b, c, d)

    try:
        out = call_fused()
    except Exception:
        out = call_fallback()
    return out.reshape(N, C, Ho, Wo)


# --------------------------------------------------------------------------
# Downsample module (deterministic init; dims=2 only)
# --------------------------------------------------------------------------
class Downsample:
    def __init__(self, channels, use_conv, dims=2, out_channels=None, key=None):
        assert dims == 2, "only dims=2 implemented"
        # TODO(synk): dims=1 and dims=3 (stride (1,2,2)) variants not implemented.
        self.channels = channels
        self.out_channels = out_channels or channels
        self.use_conv = use_conv
        if use_conv:
            key = key if key is not None else jax.random.PRNGKey(0)
            kw_, kb_ = jax.random.split(key)
            fan_in = channels * 3 * 3
            bound = 1.0 / (fan_in ** 0.5)         # PyTorch Conv2d default init range
            self.w = jax.random.uniform(
                kw_, (self.out_channels, channels, 3, 3),
                minval=-bound, maxval=bound, dtype=jnp.float32)
            self.b = jax.random.uniform(
                kb_, (self.out_channels,),
                minval=-bound, maxval=bound, dtype=jnp.float32)
        else:
            assert self.channels == self.out_channels

    def __call__(self, x, size=None, mask=None, **kwargs):
        assert x.shape[1] == self.channels
        if self.use_conv:
            assert mask is None, "Masking not implemented for use_conv!"
            return _conv2d_s2_p1(x, self.w, self.b), mask
        downsampled = _avg_pool2x2(x)
        downsampled_mask = mask
        if mask is not None:
            # Pooled in f32 then '== 1': exact for {0,1} masks (all values involved are
            # exactly representable regardless of MXU precision mode).
            downsampled_mask = _avg_pool2x2(mask.astype(jnp.float32)) == 1
        return downsampled, downsampled_mask


# --------------------------------------------------------------------------
if __name__ == "__main__":
    key = jax.random.PRNGKey(0)
    kx, km, kp, kx2, kp2 = jax.random.split(key, 5)

    N, C, H, W = 2, 4, 16, 16
    x = jax.random.normal(kx, (N, C, H, W), dtype=jnp.float32)

    # --- conv path (use_conv=True), Cout == Cin ---
    ds_conv = Downsample(C, use_conv=True, key=kp)
    y_conv, m_out = ds_conv(x)
    y_conv = jax.block_until_ready(y_conv)
    assert y_conv.shape == (N, C, H // 2, W // 2) and m_out is None
    ref = jax.lax.conv_general_dilated(
        x, ds_conv.w, window_strides=(2, 2), padding=((1, 1), (1, 1)),
        dimension_numbers=("NCHW", "OIHW", "NCHW"),
    ) + ds_conv.b[None, :, None, None]
    assert jnp.allclose(y_conv, ref, atol=1e-4, rtol=1e-4)

    # --- conv path with wide Cout: exercises Cout tiling (n_co > 1) + single-buffered phases ---
    C2, Cout2 = 8, 768
    x2 = jax.random.normal(kx2, (N, C2, H, W), dtype=jnp.float32)
    ds_conv2 = Downsample(C2, use_conv=True, out_channels=Cout2, key=kp2)
    y2, _ = ds_conv2(x2)
    y2 = jax.block_until_ready(y2)
    ref2 = jax.lax.conv_general_dilated(
        x2, ds_conv2.w, window_strides=(2, 2), padding=((1, 1), (1, 1)),
        dimension_numbers=("NCHW", "OIHW", "NCHW"),
    ) + ds_conv2.b[None, :, None, None]
    assert y2.shape == (N, Cout2, H // 2, W // 2)
    assert jnp.allclose(y2, ref2, atol=1e-4, rtol=1e-4)

    # --- avg-pool path (use_conv=False) with mask ---
    ds_pool = Downsample(C, use_conv=False)
    mask = jax.random.bernoulli(km, 0.7, (N, 1, H, W))
    y_pool, mask_ds = ds_pool(x, mask=mask)
    y_pool = jax.block_until_ready(y_pool)
    mask_ds = jax.block_until_ready(mask_ds)

    ref_pool = x.reshape(N, C, H // 2, 2, W // 2, 2).mean(axis=(3, 5))
    ref_mask = (mask.astype(jnp.float32)
                    .reshape(N, 1, H // 2, 2, W // 2, 2).mean(axis=(3, 5)) == 1)
    # Tolerance covers possible MXU default-precision rounding inside the tiny compaction
    # matmul; structural/indexing errors would be O(1).  The mask path is exact by design.
    assert jnp.allclose(y_pool, ref_pool, atol=5e-3, rtol=5e-3)
    assert bool(jnp.all(mask_ds == ref_mask))
    assert mask_ds.dtype == jnp.bool_

    print("KERNEL_OK")
</pallas_src>

<mosaic_0001>
module attributes {stable_mosaic.version = 11 : i64} {
  func.func @_conv3x3s2_kernel(%arg0: i32, %arg1: i32, %arg2: memref<1x9x1x9x8xf32, #tpu.memory_space<vmem>>, %arg3: memref<1x9x1x9x8xf32, #tpu.memory_space<vmem>>, %arg4: memref<3x8x4xf32, #tpu.memory_space<vmem>>, %arg5: memref<3x4x4xf32, #tpu.memory_space<vmem>>, %arg6: memref<1x4xf32, #tpu.memory_space<vmem>>, %arg7: memref<1x8x8x4xf32, #tpu.memory_space<vmem>>) attributes {dimension_semantics = [#tpu.dimension_semantics<parallel>, #tpu.dimension_semantics<parallel>], iteration_bounds = array<i64: 2, 1>, scalar_prefetch = 0 : i64, scratch_operands = 0 : i64, tpu.core_type = #tpu.core_type<tc>, window_params = [{transform_indices = @transform_0, window_bounds = array<i64: 1, 9, 1, 9, 8>}, {transform_indices = @transform_1, window_bounds = array<i64: 1, 9, 1, 9, 8>}, {transform_indices = @transform_2, window_bounds = array<i64: 3, 8, 4>}, {transform_indices = @transform_3, window_bounds = array<i64: 3, 4, 4>}, {transform_indices = @transform_4, window_bounds = array<i64: 1, 4>}, {transform_indices = @transform_5, window_bounds = array<i64: 1, 8, 8, 4>}]} {
    %cst = arith.constant 0.000000e+00 : f32
    %0 = vector.broadcast %cst : f32 to vector<64x4xf32>
    %c0 = arith.constant 0 : index
    %c0_0 = arith.constant 0 : index
    %c0_1 = arith.constant 0 : index
    %c0_2 = arith.constant 0 : index
    %c0_3 = arith.constant 0 : index
    %1 = vector.load %arg2[%c0, %c0_0, %c0_1, %c0_2, %c0_3] : memref<1x9x1x9x8xf32, #tpu.memory_space<vmem>>, vector<1x8x1x8x8xf32>
    %2 = vector.shape_cast %1 : vector<1x8x1x8x8xf32> to vector<8x8x8xf32>
    %3 = vector.shape_cast %2 : vector<8x8x8xf32> to vector<64x8xf32>
    %c0_4 = arith.constant 0 : index
    %c0_5 = arith.constant 0 : index
    %c0_6 = arith.constant 0 : index
    %4 = vector.load %arg4[%c0_4, %c0_5, %c0_6] : memref<3x8x4xf32, #tpu.memory_space<vmem>>, vector<1x8x4xf32>
    %5 = vector.shape_cast %4 : vector<1x8x4xf32> to vector<8x4xf32>
    %cst_7 = arith.constant dense<0.000000e+00> : vector<64x4xf32>
    %6 = tpu.matmul %3, %5, %cst_7 {dimension_numbers = #tpu.dot_dimension_numbers<[1], [0], [0], [1], [0, 0, 1, 1], [], []>} : vector<64x8xf32>, vector<8x4xf32>, vector<64x4xf32> -> vector<64x4xf32>
    %7 = arith.addf %0, %6 : vector<64x4xf32>
    %c0_8 = arith.constant 0 : index
    %c0_9 = arith.constant 0 : index
    %c0_10 = arith.constant 0 : index
    %c1 = arith.constant 1 : index
    %c0_11 = arith.constant 0 : index
    %8 = vector.load %arg2[%c0_8, %c0_9, %c0_10, %c1, %c0_11] : memref<1x9x1x9x8xf32, #tpu.memory_space<vmem>>, vector<1x8x1x8x4xf32>
    %9 = vector.shape_cast %8 : vector<1x8x1x8x4xf32> to vector<8x8x4xf32>
    %10 = vector.shape_cast %9 : vector<8x8x4xf32> to vector<64x4xf32>
    %c0_12 = arith.constant 0 : index
    %c0_13 = arith.constant 0 : index
    %c0_14 = arith.constant 0 : index
    %11 = vector.load %arg5[%c0_12, %c0_13, %c0_14] : memref<3x4x4xf32, #tpu.memory_space<vmem>>, vector<1x4x4xf32>
    %12 = vector.shape_cast %11 : vector<1x4x4xf32> to vector<4x4xf32>
    %cst_15 = arith.constant dense<0.000000e+00> : vector<64x4xf32>
    %13 = tpu.matmul %10, %12, %cst_15 {dimension_numbers = #tpu.dot_dimension_numbers<[1], [0], [0], [1], [0, 0, 1, 1], [], []>} : vector<64x4xf32>, vector<4x4xf32>, vector<64x4xf32> -> vector<64x4xf32>
    %14 = arith.addf %7, %13 : vector<64x4xf32>
    %c0_16 = arith.constant 0 : index
    %c0_17 = arith.constant 0 : index
    %c0_18 = arith.constant 0 : index
    %c0_19 = arith.constant 0 : index
    %c0_20 = arith.constant 0 : index
    %15 = vector.load %arg3[%c0_16, %c0_17, %c0_18, %c0_19, %c0_20] : memref<1x9x1x9x8xf32, #tpu.memory_space<vmem>>, vector<1x8x1x8x8xf32>
    %16 = vector.shape_cast %15 : vector<1x8x1x8x8xf32> to vector<8x8x8xf32>
    %17 = vector.shape_cast %16 : vector<8x8x8xf32> to vector<64x8xf32>
    %c1_21 = arith.constant 1 : index
    %c0_22 = arith.constant 0 : index
    %c0_23 = arith.constant 0 : index
    %18 = vector.load %arg4[%c1_21, %c0_22, %c0_23] : memref<3x8x4xf32, #tpu.memory_space<vmem>>, vector<1x8x4xf32>
    %19 = vector.shape_cast %18 : vector<1x8x4xf32> to vector<8x4xf32>
    %cst_24 = arith.constant dense<0.000000e+00> : vector<64x4xf32>
    %20 = tpu.matmul %17, %19, %cst_24 {dimension_numbers = #tpu.dot_dimension_numbers<[1], [0], [0], [1], [0, 0, 1, 1], [], []>} : vector<64x8xf32>, vector<8x4xf32>, vector<64x4xf32> -> vector<64x4xf32>
    %21 = arith.addf %14, %20 : vector<64x4xf32>
    %c0_25 = arith.constant 0 : index
    %c0_26 = arith.constant 0 : index
    %c0_27 = arith.constant 0 : index
    %c1_28 = arith.constant 1 : index
    %c0_29 = arith.constant 0 : index
    %22 = vector.load %arg3[%c0_25, %c0_26, %c0_27, %c1_28, %c0_29] : memref<1x9x1x9x8xf32, #tpu.memory_space<vmem>>, vector<1x8x1x8x4xf32>
    %23 = vector.shape_cast %22 : vector<1x8x1x8x4xf32> to vector<8x8x4xf32>
    %24 = vector.shape_cast %23 : vector<8x8x4xf32> to vector<64x4xf32>
    %c1_30 = arith.constant 1 : index
    %c0_31 = arith.constant 0 : index
    %c0_32 = arith.constant 0 : index
    %25 = vector.load %arg5[%c1_30, %c0_31, %c0_32] : memref<3x4x4xf32, #tpu.memory_space<vmem>>, vector<1x4x4xf32>
    %26 = vector.shape_cast %25 : vector<1x4x4xf32> to vector<4x4xf32>
    %cst_33 = arith.constant dense<0.000000e+00> : vector<64x4xf32>
    %27 = tpu.matmul %24, %26, %cst_33 {dimension_numbers = #tpu.dot_dimension_numbers<[1], [0], [0], [1], [0, 0, 1, 1], [], []>} : vector<64x4xf32>, vector<4x4xf32>, vector<64x4xf32> -> vector<64x4xf32>
    %28 = arith.addf %21, %27 : vector<64x4xf32>
    %c0_34 = arith.constant 0 : index
    %c1_35 = arith.constant 1 : index
    %c0_36 = arith.constant 0 : index
    %c0_37 = arith.constant 0 : index
    %c0_38 = arith.constant 0 : index
    %29 = vector.load %arg2[%c0_34, %c1_35, %c0_36, %c0_37, %c0_38] : memref<1x9x1x9x8xf32, #tpu.memory_space<vmem>>, vector<1x8x1x8x8xf32>
    %30 = vector.shape_cast %29 : vector<1x8x1x8x8xf32> to vector<8x8x8xf32>
    %31 = vector.shape_cast %30 : vector<8x8x8xf32> to vector<64x8xf32>
    %c2 = arith.constant 2 : index
    %c0_39 = arith.constant 0 : index
    %c0_40 = arith.constant 0 : index
    %32 = vector.load %arg4[%c2, %c0_39, %c0_40] : memref<3x8x4xf32, #tpu.memory_space<vmem>>, vector<1x8x4xf32>
    %33 = vector.shape_cast %32 : vector<1x8x4xf32> to vector<8x4xf32>
    %cst_41 = arith.constant dense<0.000000e+00> : vector<64x4xf32>
    %34 = tpu.matmul %31, %33, %cst_41 {dimension_numbers = #tpu.dot_dimension_numbers<[1], [0], [0], [1], [0, 0, 1, 1], [], []>} : vector<64x8xf32>, vector<8x4xf32>, vector<64x4xf32> -> vector<64x4xf32>
    %35 = arith.addf %28, %34 : vector<64x4xf32>
    %c0_42 = arith.constant 0 : index
    %c1_43 = arith.constant 1 : index
    %c0_44 = arith.constant 0 : index
    %c1_45 = arith.constant 1 : index
    %c0_46 = arith.constant 0 : index
    %36 = vector.load %arg2[%c0_42, %c1_43, %c0_44, %c1_45, %c0_46] : memref<1x9x1x9x8xf32, #tpu.memory_space<vmem>>, vector<1x8x1x8x4xf32>
    %37 = vector.shape_cast %36 : vector<1x8x1x8x4xf32> to vector<8x8x4xf32>
    %38 = vector.shape_cast %37 : vector<8x8x4xf32> to vector<64x4xf32>
    %c2_47 = arith.constant 2 : index
    %c0_48 = arith.constant 0 : index
    %c0_49 = arith.constant 0 : index
    %39 = vector.load %arg5[%c2_47, %c0_48, %c0_49] : memref<3x4x4xf32, #tpu.memory_space<vmem>>, vector<1x4x4xf32>
    %40 = vector.shape_cast %39 : vector<1x4x4xf32> to vector<4x4xf32>
    %cst_50 = arith.constant dense<0.000000e+00> : vector<64x4xf32>
    %41 = tpu.matmul %38, %40, %cst_50 {dimension_numbers = #tpu.dot_dimension_numbers<[1], [0], [0], [1], [0, 0, 1, 1], [], []>} : vector<64x4xf32>, vector<4x4xf32>, vector<64x4xf32> -> vector<64x4xf32>
    %42 = arith.addf %35, %41 : vector<64x4xf32>
    %c0_51 = arith.constant 0 : index
    %c0_52 = arith.constant 0 : index
    %43 = vector.load %arg6[%c0_51, %c0_52] : memref<1x4xf32, #tpu.memory_space<vmem>>, vector<1x4xf32>
    %44 = vector.broadcast %43 : vector<1x4xf32> to vector<64x4xf32>
    %45 = arith.addf %42, %44 : vector<64x4xf32>
    %46 = vector.shape_cast %45 : vector<64x4xf32> to vector<8x8x4xf32>
    %c0_53 = arith.constant 0 : index
    %c0_54 = arith.constant 0 : index
    %c0_55 = arith.constant 0 : index
    %c0_56 = arith.constant 0 : index
    %47 = vector.load %arg7[%c0_53, %c0_54, %c0_55, %c0_56] : memref<1x8x8x4xf32, #tpu.memory_space<vmem>>, vector<1x8x8x4xf32>
    %48 = vector.shape_cast %47 : vector<1x8x8x4xf32> to vector<8x8x4xf32>
    %49 = vector.shape_cast %46 : vector<8x8x4xf32> to vector<1x8x8x4xf32>
    tpu.vector_store %arg7[%c0_53, %c0_54, %c0_55, %c0_56], %49 {strides = array<i32>} : memref<1x8x8x4xf32, #tpu.memory_space<vmem>>, vector<1x8x8x4xf32>,
    return
  }
  func.func @transform_0(%arg0: i32, %arg1: i32) -> (i32, i32, i32, i32, i32) {
    %c0_i32 = arith.constant 0 : i32
    %c0_i32_0 = arith.constant 0 : i32
    %c0_i32_1 = arith.constant 0 : i32
    %c0_i32_2 = arith.constant 0 : i32
    %c0_i32_3 = arith.constant 0 : i32
    return %arg0, %c0_i32, %c0_i32_0, %c0_i32_1, %c0_i32_2 : i32, i32, i32, i32, i32
  }
  func.func @transform_1(%arg0: i32, %arg1: i32) -> (i32, i32, i32, i32, i32) {
    %c0_i32 = arith.constant 0 : i32
    %c1_i32 = arith.constant 1 : i32
    %c0_i32_0 = arith.constant 0 : i32
    %c0_i32_1 = arith.constant 0 : i32
    %c0_i32_2 = arith.constant 0 : i32
    return %arg0, %c0_i32, %c1_i32, %c0_i32_0, %c0_i32_1 : i32, i32, i32, i32, i32
  }
  func.func @transform_2(%arg0: i32, %arg1: i32) -> (i32, i32, i32) {
    %c0_i32 = arith.constant 0 : i32
    %c0_i32_0 = arith.constant 0 : i32
    %c0_i32_1 = arith.constant 0 : i32
    return %c0_i32, %c0_i32_0, %arg1 : i32, i32, i32
  }
  func.func @transform_3(%arg0: i32, %arg1: i32) -> (i32, i32, i32) {
    %c0_i32 = arith.constant 0 : i32
    %c0_i32_0 = arith.constant 0 : i32
    %c0_i32_1 = arith.constant 0 : i32
    return %c0_i32, %c0_i32_0, %arg1 : i32, i32, i32
  }
  func.func @transform_4(%arg0: i32, %arg1: i32) -> (i32, i32) {
    %c0_i32 = arith.constant 0 : i32
    %c0_i32_0 = arith.constant 0 : i32
    return %c0_i32, %arg1 : i32, i32
  }
  func.func @transform_5(%arg0: i32, %arg1: i32) -> (i32, i32, i32, i32) {
    %c0_i32 = arith.constant 0 : i32
    %c0_i32_0 = arith.constant 0 : i32
    %c0_i32_1 = arith.constant 0 : i32
    return %arg0, %c0_i32, %c0_i32_0, %arg1 : i32, i32, i32, i32
  }
}

module attributes {stable_mosaic.version = 11 : i64} {
  func.func @_conv3x3s2_kernel(%arg0: i32, %arg1: i32, %arg2: memref<1x9x1x9x8xf32, #tpu.memory_space<vmem>>, %arg3: memref<1x9x1x9x8xf32, #tpu.memory_space<vmem>>, %arg4: memref<3x8x4xf32, #tpu.memory_space<vmem>>, %arg5: memref<3x4x4xf32, #tpu.memory_space<vmem>>, %arg6: memref<1x4xf32, #tpu.memory_space<vmem>>, %arg7: memref<1x8x8x4xf32, #tpu.memory_space<vmem>>) attributes {dimension_semantics = [#tpu.dimension_semantics<parallel>, #tpu.dimension_semantics<parallel>], iteration_bounds = array<i64: 2, 1>, scalar_prefetch = 0 : i64, scratch_operands = 0 : i64, tpu.core_type = #tpu.core_type<tc>, window_params = [{transform_indices = @transform_0, window_bounds = array<i64: 1, 9, 1, 9, 8>}, {transform_indices = @transform_1, window_bounds = array<i64: 1, 9, 1, 9, 8>}, {transform_indices = @transform_2, window_bounds = array<i64: 3, 8, 4>}, {transform_indices = @transform_3, window_bounds = array<i64: 3, 4, 4>}, {transform_indices = @transform_4, window_bounds = array<i64: 1, 4>}, {transform_indices = @transform_5, window_bounds = array<i64: 1, 8, 8, 4>}]} {
    %cst = arith.constant 0.000000e+00 : f32
    %0 = vector.broadcast %cst : f32 to vector<64x4xf32>
    %c0 = arith.constant 0 : index
    %c0_0 = arith.constant 0 : index
    %c0_1 = arith.constant 0 : index
    %c0_2 = arith.constant 0 : index
    %c0_3 = arith.constant 0 : index
    %1 = vector.load %arg2[%c0, %c0_0, %c0_1, %c0_2, %c0_3] : memref<1x9x1x9x8xf32, #tpu.memory_space<vmem>>, vector<1x8x1x8x8xf32>
    %2 = vector.shape_cast %1 : vector<1x8x1x8x8xf32> to vector<8x8x8xf32>
    %3 = vector.shape_cast %2 : vector<8x8x8xf32> to vector<64x8xf32>
    %c0_4 = arith.constant 0 : index
    %c0_5 = arith.constant 0 : index
    %c0_6 = arith.constant 0 : index
    %4 = vector.load %arg4[%c0_4, %c0_5, %c0_6] : memref<3x8x4xf32, #tpu.memory_space<vmem>>, vector<1x8x4xf32>
    %5 = vector.shape_cast %4 : vector<1x8x4xf32> to vector<8x4xf32>
    %cst_7 = arith.constant dense<0.000000e+00> : vector<64x4xf32>
    %6 = tpu.matmul %3, %5, %cst_7 {dimension_numbers = #tpu.dot_dimension_numbers<[1], [0], [0], [1], [0, 0, 1, 1], [], []>} : vector<64x8xf32>, vector<8x4xf32>, vector<64x4xf32> -> vector<64x4xf32>
    %7 = arith.addf %0, %6 : vector<64x4xf32>
    %c0_8 = arith.constant 0 : index
    %c0_9 = arith.constant 0 : index
    %c0_10 = arith.constant 0 : index
    %c1 = arith.constant 1 : index
    %c0_11 = arith.constant 0 : index
    %8 = vector.load %arg2[%c0_8, %c0_9, %c0_10, %c1, %c0_11] : memref<1x9x1x9x8xf32, #tpu.memory_space<vmem>>, vector<1x8x1x8x4xf32>
    %9 = vector.shape_cast %8 : vector<1x8x1x8x4xf32> to vector<8x8x4xf32>
    %10 = vector.shape_cast %9 : vector<8x8x4xf32> to vector<64x4xf32>
    %c0_12 = arith.constant 0 : index
    %c0_13 = arith.constant 0 : index
    %c0_14 = arith.constant 0 : index
    %11 = vector.load %arg5[%c0_12, %c0_13, %c0_14] : memref<3x4x4xf32, #tpu.memory_space<vmem>>, vector<1x4x4xf32>
    %12 = vector.shape_cast %11 : vector<1x4x4xf32> to vector<4x4xf32>
    %cst_15 = arith.constant dense<0.000000e+00> : vector<64x4xf32>
    %13 = tpu.matmul %10, %12, %cst_15 {dimension_numbers = #tpu.dot_dimension_numbers<[1], [0], [0], [1], [0, 0, 1, 1], [], []>} : vector<64x4xf32>, vector<4x4xf32>, vector<64x4xf32> -> vector<64x4xf32>
    %14 = arith.addf %7, %13 : vector<64x4xf32>
    %c0_16 = arith.constant 0 : index
    %c0_17 = arith.constant 0 : index
    %c0_18 = arith.constant 0 : index
    %c0_19 = arith.constant 0 : index
    %c0_20 = arith.constant 0 : index
    %15 = vector.load %arg3[%c0_16, %c0_17, %c0_18, %c0_19, %c0_20] : memref<1x9x1x9x8xf32, #tpu.memory_space<vmem>>, vector<1x8x1x8x8xf32>
    %16 = vector.shape_cast %15 : vector<1x8x1x8x8xf32> to vector<8x8x8xf32>
    %17 = vector.shape_cast %16 : vector<8x8x8xf32> to vector<64x8xf32>
    %c1_21 = arith.constant 1 : index
    %c0_22 = arith.constant 0 : index
    %c0_23 = arith.constant 0 : index
    %18 = vector.load %arg4[%c1_21, %c0_22, %c0_23] : memref<3x8x4xf32, #tpu.memory_space<vmem>>, vector<1x8x4xf32>
    %19 = vector.shape_cast %18 : vector<1x8x4xf32> to vector<8x4xf32>
    %cst_24 = arith.constant dense<0.000000e+00> : vector<64x4xf32>
    %20 = tpu.matmul %17, %19, %cst_24 {dimension_numbers = #tpu.dot_dimension_numbers<[1], [0], [0], [1], [0, 0, 1, 1], [], []>} : vector<64x8xf32>, vector<8x4xf32>, vector<64x4xf32> -> vector<64x4xf32>
    %21 = arith.addf %14, %20 : vector<64x4xf32>
    %c0_25 = arith.constant 0 : index
    %c0_26 = arith.constant 0 : index
    %c0_27 = arith.constant 0 : index
    %c1_28 = arith.constant 1 : index
    %c0_29 = arith.constant 0 : index
    %22 = vector.load %arg3[%c0_25, %c0_26, %c0_27, %c1_28, %c0_29] : memref<1x9x1x9x8xf32, #tpu.memory_space<vmem>>, vector<1x8x1x8x4xf32>
    %23 = vector.shape_cast %22 : vector<1x8x1x8x4xf32> to vector<8x8x4xf32>
    %24 = vector.shape_cast %23 : vector<8x8x4xf32> to vector<64x4xf32>
    %c1_30 = arith.constant 1 : index
    %c0_31 = arith.constant 0 : index
    %c0_32 = arith.constant 0 : index
    %25 = vector.load %arg5[%c1_30, %c0_31, %c0_32] : memref<3x4x4xf32, #tpu.memory_space<vmem>>, vector<1x4x4xf32>
    %26 = vector.shape_cast %25 : vector<1x4x4xf32> to vector<4x4xf32>
    %cst_33 = arith.constant dense<0.000000e+00> : vector<64x4xf32>
    %27 = tpu.matmul %24, %26, %cst_33 {dimension_numbers = #tpu.dot_dimension_numbers<[1], [0], [0], [1], [0, 0, 1, 1], [], []>} : vector<64x4xf32>, vector<4x4xf32>, vector<64x4xf32> -> vector<64x4xf32>
    %28 = arith.addf %21, %27 : vector<64x4xf32>
    %c0_34 = arith.constant 0 : index
    %c1_35 = arith.constant 1 : index
    %c0_36 = arith.constant 0 : index
    %c0_37 = arith.constant 0 : index
    %c0_38 = arith.constant 0 : index
    %29 = vector.load %arg2[%c0_34, %c1_35, %c0_36, %c0_37, %c0_38] : memref<1x9x1x9x8xf32, #tpu.memory_space<vmem>>, vector<1x8x1x8x8xf32>
    %30 = vector.shape_cast %29 : vector<1x8x1x8x8xf32> to vector<8x8x8xf32>
    %31 = vector.shape_cast %30 : vector<8x8x8xf32> to vector<64x8xf32>
    %c2 = arith.constant 2 : index
    %c0_39 = arith.constant 0 : index
    %c0_40 = arith.constant 0 : index
    %32 = vector.load %arg4[%c2, %c0_39, %c0_40] : memref<3x8x4xf32, #tpu.memory_space<vmem>>, vector<1x8x4xf32>
    %33 = vector.shape_cast %32 : vector<1x8x4xf32> to vector<8x4xf32>
    %cst_41 = arith.constant dense<0.000000e+00> : vector<64x4xf32>
    %34 = tpu.matmul %31, %33, %cst_41 {dimension_numbers = #tpu.dot_dimension_numbers<[1], [0], [0], [1], [0, 0, 1, 1], [], []>} : vector<64x8xf32>, vector<8x4xf32>, vector<64x4xf32> -> vector<64x4xf32>
    %35 = arith.addf %28, %34 : vector<64x4xf32>
    %c0_42 = arith.constant 0 : index
    %c1_43 = arith.constant 1 : index
    %c0_44 = arith.constant 0 : index
    %c1_45 = arith.constant 1 : index
    %c0_46 = arith.constant 0 : index
    %36 = vector.load %arg2[%c0_42, %c1_43, %c0_44, %c1_45, %c0_46] : memref<1x9x1x9x8xf32, #tpu.memory_space<vmem>>, vector<1x8x1x8x4xf32>
    %37 = vector.shape_cast %36 : vector<1x8x1x8x4xf32> to vector<8x8x4xf32>
    %38 = vector.shape_cast %37 : vector<8x8x4xf32> to vector<64x4xf32>
    %c2_47 = arith.constant 2 : index
    %c0_48 = arith.constant 0 : index
    %c0_49 = arith.constant 0 : index
    %39 = vector.load %arg5[%c2_47, %c0_48, %c0_49] : memref<3x4x4xf32, #tpu.memory_space<vmem>>, vector<1x4x4xf32>
    %40 = vector.shape_cast %39 : vector<1x4x4xf32> to vector<4x4xf32>
    %cst_50 = arith.constant dense<0.000000e+00> : vector<64x4xf32>
    %41 = tpu.matmul %38, %40, %cst_50 {dimension_numbers = #tpu.dot_dimension_numbers<[1], [0], [0], [1], [0, 0, 1, 1], [], []>} : vector<64x4xf32>, vector<4x4xf32>, vector<64x4xf32> -> vector<64x4xf32>
    %42 = arith.addf %35, %41 : vector<64x4xf32>
    %c0_51 = arith.constant 0 : index
    %c0_52 = arith.constant 0 : index
    %43 = vector.load %arg6[%c0_51, %c0_52] : memref<1x4xf32, #tpu.memory_space<vmem>>, vector<1x4xf32>
    %44 = vector.broadcast %43 : vector<1x4xf32> to vector<64x4xf32>
    %45 = arith.addf %42, %44 : vector<64x4xf32>
    %46 = vector.shape_cast %45 : vector<64x4xf32> to vector<8x8x4xf32>
    %c0_53 = arith.constant 0 : index
    %c0_54 = arith.constant 0 : index
    %c0_55 = arith.constant 0 : index
    %c0_56 = arith.constant 0 : index
    %47 = vector.load %arg7[%c0_53, %c0_54, %c0_55, %c0_56] : memref<1x8x8x4xf32, #tpu.memory_space<vmem>>, vector<1x8x8x4xf32>
    %48 = vector.shape_cast %47 : vector<1x8x8x4xf32> to vector<8x8x4xf32>
    %49 = vector.shape_cast %46 : vector<8x8x4xf32> to vector<1x8x8x4xf32>
    tpu.vector_store %arg7[%c0_53, %c0_54, %c0_55, %c0_56], %49 {strides = array<i32>} : memref<1x8x8x4xf32, #tpu.memory_space<vmem>>, vector<1x8x8x4xf32>,
    return
  }
  func.func @transform_0(%arg0: i32, %arg1: i32) -> (i32, i32, i32, i32, i32) {
    %c0_i32 = arith.constant 0 : i32
    %c0_i32_0 = arith.constant 0 : i32
    %c0_i32_1 = arith.constant 0 : i32
    %c0_i32_2 = arith.constant 0 : i32
    %c0_i32_3 = arith.constant 0 : i32
    return %arg0, %c0_i32, %c0_i32_0, %c0_i32_1, %c0_i32_2 : i32, i32, i32, i32, i32
  }
  func.func @transform_1(%arg0: i32, %arg1: i32) -> (i32, i32, i32, i32, i32) {
    %c0_i32 = arith.constant 0 : i32
    %c1_i32 = arith.constant 1 : i32
    %c0_i32_0 = arith.constant 0 : i32
    %c0_i32_1 = arith.constant 0 : i32
    %c0_i32_2 = arith.constant 0 : i32
    return %arg0, %c0_i32, %c1_i32, %c0_i32_0, %c0_i32_1 : i32, i32, i32, i32, i32
  }
  func.func @transform_2(%arg0: i32, %arg1: i32) -> (i32, i32, i32) {
    %c0_i32 = arith.constant 0 : i32
    %c0_i32_0 = arith.constant 0 : i32
    %c0_i32_1 = arith.constant 0 : i32
    return %c0_i32, %c0_i32_0, %arg1 : i32, i32, i32
  }
  func.func @transform_3(%arg0: i32, %arg1: i32) -> (i32, i32, i32) {
    %c0_i32 = arith.constant 0 : i32
    %c0_i32_0 = arith.constant 0 : i32
    %c0_i32_1 = arith.constant 0 : i32
    return %c0_i32, %c0_i32_0, %arg1 : i32, i32, i32
  }
  func.func @transform_4(%arg0: i32, %arg1: i32) -> (i32, i32) {
    %c0_i32 = arith.constant 0 : i32
    %c0_i32_0 = arith.constant 0 : i32
    return %c0_i32, %arg1 : i32, i32
  }
  func.func @transform_5(%arg0: i32, %arg1: i32) -> (i32, i32, i32, i32) {
    %c0_i32 = arith.constant 0 : i32
    %c0_i32_0 = arith.constant 0 : i32
    %c0_i32_1 = arith.constant 0 : i32
    return %arg0, %c0_i32, %c0_i32_0, %arg1 : i32, i32, i32, i32
  }
}

</mosaic_0001>

<bundles_post_ra>
// kernel: tpu_custom_call.1
= control target key start
LH: loop header
LB: loop body
LE: loop exit
PB: predicated region body
PF: predicated region fallthrough
CT: control target
= control target key end

     0   :  { %s1963_s18 = smov 0   ;;  %s1965_s19 = smov 0   ;;  %s2261_s0 = inlined_call_operand.vmem [shape: f32[2,9,2,9,8], index: 0, kind: input, shape index: {}]   ;;  %s2262_s1 = inlined_call_operand.vmem [shape: f32[2,9,2,9,8], index: 1, kind: input, shape index: {}]   ;;  %s2263_s2 = inlined_call_operand.vmem [shape: f32[3,8,4], index: 2, kind: input, shape index: {}]   ;;  %s2264_s3 = inlined_call_operand.vmem [shape: f32[3,4,4], index: 3, kind: input, shape index: {}]   ;;  %s2265_s4 = inlined_call_operand.vmem [shape: f32[1,4], index: 4, kind: input, shape index: {}]   ;;  %s2266_s5 = inlined_call_operand.vmem [shape: f32[2,8,8,4], index: 5, kind: output, shape index: {}]  }
   0x1   :  { %s1967_s20 = smov 0   ;;  %s1969_s21 = smov 0  }
   0x2   :  { %s1971_s22 = smov 0  }
   0x3 LB: > { %s27_s23 = sadd.s32 1, %s1927_s21  ;;  %p41_p1 = scmp.ne.s32.totalorder %s1919_s19, %s1915_s18  ;;  %s1931_s22 = sphi %s1971_s22, %s15_s22   ;;  %s1927_s21 = sphi %s1969_s21, %s2271_s21   ;;  %s1923_s20 = sphi %s1967_s20, %s2270_s20   ;;  %s1919_s19 = sphi %s1965_s19, %s2269_s19   ;;  %s1915_s18 = sphi %s1963_s18, %s2268_s18  }
   0x4   : > { %p29_p0 = scmp.ge.s32.totalorder %s27_s23, 2  ;;  %p42_p2 = scmp.eq.s32.totalorder %s1931_s22, 0 }
   0x5   : > { %s34_s26 = sadd.s32 1, %s1919_s19  ;;  %p1572_p5 = scmp.ge.s32.totalorder %s1931_s22, 2 }
   0x6   : > { %s2273_s23 = smov (%p29_p0, %s27_s23), 0  ;;  %p1994_p3 = por %p42_p2, %p41_p1 }
   0x7   : > { %s31_s25 = ssub.s32 %s1927_s21, %s2273_s23  ;;  %219 = sbr.rel (%p1572_p5) target bundleno = 42 (0x2a), region = 28 }
   0x8   : > { %p32_p4 = scmp.eq.s32.totalorder %s31_s25, 0 }
   0xa   : > { %s2002_s27 = scalar_select %p32_p4, %s1919_s19, %s34_s26  }
   0xe   : > { %222 = sbr.rel (!%p1994_p3) target bundleno = 28 (0x1c), region = 32  ;;  %s224_s28 = sand.u32 (%p1994_p3), 1, %s1919_s19  }
   0xf   : > { %s1850_s29 = smul.u32 (%p1994_p3), 288, %s1927_s21 }
  0x10   : > { %s1849_s30 = smul.u32 (%p1994_p3), 144, %s224_s28 }
  0x11   : > { %s2012_s8 = scalar_lea.vmem (%p1994_p3), %s2261_s0, %s1850_s29 }
  0x12   : > { %v291_v0 = vld [vmem:[%s2012_s8] sm:$0xff] (%p1994_p3)  ;;  %v293_v1 = vld [vmem:[%s2012_s8 + $0x8] sm:$0xff] (%p1994_p3)  ;;  %s2017_s9 = scalar_lea.vmem (%p1994_p3), [#allocation2], %s1849_s30 }
  0x13   : > { %v295_v2 = vld [vmem:[%s2012_s8 + $0x20] sm:$0xff] (%p1994_p3)  ;;  %292 = vst [vmem:[%s2017_s9] sm:$0xff] (%p1994_p3), %v291_v0  ;;  %294 = vst [vmem:[%s2017_s9 + $0x8] sm:$0xff] (%p1994_p3), %v293_v1  ;;  %v297_v3 = vld [vmem:[%s2012_s8 + $0x28] sm:$0xff] (%p1994_p3) }
  0x14   : > { %296 = vst [vmem:[%s2017_s9 + $0x10] sm:$0xff] (%p1994_p3), %v295_v2  ;;  %v299_v4 = vld [vmem:[%s2012_s8 + $0x40] sm:$0xff] (%p1994_p3)  ;;  %v301_v5 = vld [vmem:[%s2012_s8 + $0x48] sm:$0xff] (%p1994_p3)  ;;  %298 = vst [vmem:[%s2017_s9 + $0x18] sm:$0xff] (%p1994_p3), %v297_v3 }
  0x15   : > { %300 = vst [vmem:[%s2017_s9 + $0x20] sm:$0xff] %v299_v4  ;;  %302 = vst [vmem:[%s2017_s9 + $0x28] sm:$0xff] %v301_v5  ;;  %v303_v6 = vld [vmem:[%s2012_s8 + $0x60] sm:$0xff]  ;;  %v305_v7 = vld [vmem:[%s2012_s8 + $0x68] sm:$0xff] }
  0x16   : > { %v307_v8 = vld [vmem:[%s2012_s8 + $0x80] sm:$0xff]  ;;  %304 = vst [vmem:[%s2017_s9 + $0x30] sm:$0xff] %v303_v6  ;;  %306 = vst [vmem:[%s2017_s9 + $0x38] sm:$0xff] %v305_v7  ;;  %v309_v9 = vld [vmem:[%s2012_s8 + $0x88] sm:$0xff] }
  0x17   : > { %308 = vst [vmem:[%s2017_s9 + $0x40] sm:$0xff] %v307_v8  ;;  %v311_v10 = vld [vmem:[%s2012_s8 + $0xa0] sm:$0xff]  ;;  %v313_v11 = vld [vmem:[%s2012_s8 + $0xa8] sm:$0xff]  ;;  %310 = vst [vmem:[%s2017_s9 + $0x48] sm:$0xff] %v309_v9 }
  0x18   : > { %312 = vst [vmem:[%s2017_s9 + $0x50] sm:$0xff] %v311_v10  ;;  %314 = vst [vmem:[%s2017_s9 + $0x58] sm:$0xff] %v313_v11  ;;  %v315_v12 = vld [vmem:[%s2012_s8 + $0xc0] sm:$0xff]  ;;  %v317_v13 = vld [vmem:[%s2012_s8 + $0xc8] sm:$0xff] }
  0x19   : > { %v319_v14 = vld [vmem:[%s2012_s8 + $0xe0] sm:$0xff]  ;;  %316 = vst [vmem:[%s2017_s9 + $0x60] sm:$0xff] %v315_v12  ;;  %318 = vst [vmem:[%s2017_s9 + $0x68] sm:$0xff] %v317_v13  ;;  %v321_v15 = vld [vmem:[%s2012_s8 + $0xe8] sm:$0xff] }
  0x1a   : > { %320 = vst [vmem:[%s2017_s9 + $0x70] sm:$0xff] %v319_v14  ;;  %v323_v16 = vld [vmem:[%s2012_s8 + $0x100] sm:$0xff]  ;;  %v325_v17 = vld [vmem:[%s2012_s8 + $0x108] sm:$0xff]  ;;  %322 = vst [vmem:[%s2017_s9 + $0x78] sm:$0xff] %v321_v15 }
  0x1b   : > { %324 = vst [vmem:[%s2017_s9 + $0x80] sm:$0xff] %v323_v16  ;;  %326 = vst [vmem:[%s2017_s9 + $0x88] sm:$0xff] %v325_v17 }
  0x1c PF: > { %332 = sbr.rel (!%p1994_p3) target bundleno = 42 (0x2a), region = 70  ;;  %s334_s10 = sand.u32 (%p1994_p3), 1, %s1919_s19  }
  0x1d   : > { %s1574_s11 = smul.u32 (%p1994_p3), 288, %s1927_s21 }
  0x1e   : > { %s1851_s12 = smul.u32 (%p1994_p3), 144, %s334_s10 }
  0x1f   : > { %s2059_s15 = scalar_lea.vmem (%p1994_p3), %s2262_s1, %s1574_s11 }
  0x20   : > { %v1575_v18 = vld [vmem:[%s2059_s15 + $0x10] sm:$0xff] (%p1994_p3)  ;;  %v1576_v19 = vld [vmem:[%s2059_s15 + $0x18] sm:$0xff] (%p1994_p3)  ;;  %s2064_s16 = scalar_lea.vmem (%p1994_p3), [#allocation3], %s1851_s12 }
  0x21   : > { %v1577_v20 = vld [vmem:[%s2059_s15 + $0x30] sm:$0xff] (%p1994_p3)  ;;  %403 = vst [vmem:[%s2064_s16] sm:$0xff] (%p1994_p3), %v1575_v18  ;;  %405 = vst [vmem:[%s2064_s16 + $0x8] sm:$0xff] (%p1994_p3), %v1576_v19  ;;  %v1578_v21 = vld [vmem:[%s2059_s15 + $0x38] sm:$0xff] (%p1994_p3) }
  0x22   : > { %407 = vst [vmem:[%s2064_s16 + $0x10] sm:$0xff] (%p1994_p3), %v1577_v20  ;;  %v1579_v22 = vld [vmem:[%s2059_s15 + $0x50] sm:$0xff] (%p1994_p3)  ;;  %v1580_v23 = vld [vmem:[%s2059_s15 + $0x58] sm:$0xff] (%p1994_p3)  ;;  %409 = vst [vmem:[%s2064_s16 + $0x18] sm:$0xff] (%p1994_p3), %v1578_v21 }
  0x23   : > { %411 = vst [vmem:[%s2064_s16 + $0x20] sm:$0xff] %v1579_v22  ;;  %413 = vst [vmem:[%s2064_s16 + $0x28] sm:$0xff] %v1580_v23  ;;  %v1581_v24 = vld [vmem:[%s2059_s15 + $0x70] sm:$0xff]  ;;  %v1582_v25 = vld [vmem:[%s2059_s15 + $0x78] sm:$0xff] }
  0x24   : > { %v1583_v26 = vld [vmem:[%s2059_s15 + $0x90] sm:$0xff]  ;;  %415 = vst [vmem:[%s2064_s16 + $0x30] sm:$0xff] %v1581_v24  ;;  %417 = vst [vmem:[%s2064_s16 + $0x38] sm:$0xff] %v1582_v25  ;;  %v1584_v27 = vld [vmem:[%s2059_s15 + $0x98] sm:$0xff] }
  0x25   : > { %419 = vst [vmem:[%s2064_s16 + $0x40] sm:$0xff] %v1583_v26  ;;  %v1585_v28 = vld [vmem:[%s2059_s15 + $0xb0] sm:$0xff]  ;;  %v1586_v29 = vld [vmem:[%s2059_s15 + $0xb8] sm:$0xff]  ;;  %421 = vst [vmem:[%s2064_s16 + $0x48] sm:$0xff] %v1584_v27 }
  0x26   : > { %423 = vst [vmem:[%s2064_s16 + $0x50] sm:$0xff] %v1585_v28  ;;  %425 = vst [vmem:[%s2064_s16 + $0x58] sm:$0xff] %v1586_v29  ;;  %v1587_v30 = vld [vmem:[%s2059_s15 + $0xd0] sm:$0xff]  ;;  %v1588_v31 = vld [vmem:[%s2059_s15 + $0xd8] sm:$0xff] }
  0x27   : > { %v1589_v32 = vld [vmem:[%s2059_s15 + $0xf0] sm:$0xff]  ;;  %427 = vst [vmem:[%s2064_s16 + $0x60] sm:$0xff] %v1587_v30  ;;  %429 = vst [vmem:[%s2064_s16 + $0x68] sm:$0xff] %v1588_v31  ;;  %v1590_v33 = vld [vmem:[%s2059_s15 + $0xf8] sm:$0xff] }
  0x28   : > { %431 = vst [vmem:[%s2064_s16 + $0x70] sm:$0xff] %v1589_v32  ;;  %v1591_v34 = vld [vmem:[%s2059_s15 + $0x110] sm:$0xff]  ;;  %v1592_v35 = vld [vmem:[%s2059_s15 + $0x118] sm:$0xff]  ;;  %433 = vst [vmem:[%s2064_s16 + $0x78] sm:$0xff] %v1590_v33 }
  0x29   : > { %435 = vst [vmem:[%s2064_s16 + $0x80] sm:$0xff] %v1591_v34  ;;  %437 = vst [vmem:[%s2064_s16 + $0x88] sm:$0xff] %v1592_v35 }
  0x2a PF: > { %p1593_p6 = scmp.ge.s32.totalorder %s1931_s22, 1  ;;  %p442_p7 = scmp.lt.s32.totalorder %s1931_s22, 3 }
  0x2c   : > { %p443_p8 = pnand %p1593_p6, %p442_p7 }
  0x2d   : > { %v537_v36 = vld [vmem:[%s2264_s3] sm:$0xf] (!%p443_p8)  ;;  %vm563_vm0 = vcmask (!%p443_p8), 1043456   ;;  %v1622_v37 = vld [vmem:[%s2264_s3 + $0x4] sm:$0xf] (!%p443_p8)  ;;  %s449_s28 = sand.u32 (!%p443_p8), 1, %s1915_s18  }
  0x2e   : > { %446 = sbr.rel (%p443_p8) target bundleno = 315 (0x13b), region = 108  ;;  %1725 = vmatprep.subr.msk.mxu1 (!%p443_p8), %vm563_vm0, %v537_v36  ;;  %1767 = vmatprep.subr.msk.mxu0 (!%p443_p8), %vm563_vm0, %v1622_v37  ;;  %v528_v38 = vld [vmem:[%s2263_s2] sm:$0xff] (!%p443_p8)  ;;  %v1640_v39 = vld [vmem:[%s2263_s2 + $0x10] sm:$0xff] (!%p443_p8)  ;;  %vm538_vm1 = vcmask (!%p443_p8), 31744   ;;  %v1613_v46 = vld [vmem:[%s2263_s2 + $0x8] sm:$0xff] (!%p443_p8)  ;;  %vm672_vm2 = vcmask (!%p443_p8), 64512  }
  0x2f   : > { %s1852_s29 = smul.u32 (!%p443_p8), 144, %s449_s28  ;;  %1726 = vmatpush3.msk.msra.mxu1 (!%p443_p8), %vm563_vm0, %v537_v36  ;;  %1768 = vmatpush3.msk.msra.mxu0 (!%p443_p8), %vm563_vm0, %v1622_v37  ;;  %v1657_v47 = vld [vmem:[%s2264_s3 + $0x8] sm:$0xf] (!%p443_p8)  ;;  %p512_p9 = scmp.lt.s32.totalorder (!%p443_p8), %s1923_s20, 1  ;;  %v1667_v14 = vld [vmem:[%s2265_s4] ss:$0 sm:$0xff] (!%p443_p8) }
  0x30   : > { %1739 = vmatprep.subr.mxu1 (!%p443_p8), %v528_v38  ;;  %1781 = vmatprep.subr.mxu0 (!%p443_p8), %v1640_v39 }
  0x31   : > { %s2118_s18 = scalar_lea.vmem (!%p443_p8), [#allocation2], %s1852_s29  ;;  %s2121_s9 = scalar_lea.vmem (!%p443_p8), [#allocation3], %s1852_s29 }
  0x32   : > { %v529_v40 = vld [vmem:[%s2118_s18 + $0x1] sm:$0xff] (!%p443_p8)  ;;  %v2125_v42 = vld [vmem:[%s2118_s18 + $0x11] sm:$0xff] (!%p443_p8) }
  0x33   : > { %v949_v41 = vld [vmem:[%s2121_s9 + $0x1] sm:$0xff] (!%p443_p8)  ;;  %1727 = vmatprep.mubr.msk.f32.mxu1 (!%p443_p8), %vm538_vm1, %v529_v40  ;;  %v950_v43 = vld [vmem:[%s2121_s9 + $0x11] sm:$0xff] (!%p443_p8) }
  0x34   : > { %1769 = vmatprep.mubr.msk.f32.mxu0 (!%p443_p8), %vm538_vm1, %v949_v41  ;;  %v2131_v44 = vld [vmem:[%s2118_s18 + $0x21] sm:$0xff] (!%p443_p8)  ;;  %1728 = vmatmul.mubr.msk.f32.vlgmr.msra.gmra.mrb[0].mxu1 (!%p443_p8), %vm538_vm1, %v2125_v42  ;;  %v532_v48 = vld [vmem:[%s2118_s18 + $0x31] sm:$0xff] (!%p443_p8) }
  0x35   : > { %v951_v45 = vld [vmem:[%s2121_s9 + $0x21] sm:$0xff]  ;;  %1770 = vmatmul.mubr.msk.f32.vlgmr.msra.gmra.mrb[0].mxu0 %vm538_vm1, %v950_v43  ;;  %1740 = vmatpush3.msra.mxu1 %v528_v38  ;;  %v952_v49 = vld [vmem:[%s2121_s9 + $0x31] sm:$0xff]  ;;  %s2275_s20 = smov (!%p512_p9, %s1923_s20), 1 }
  0x36   : > { %1782 = vmatpush3.msra.mxu0 %v1640_v39  ;;  %1730 = vmatprep.mubr.msk.f32.mxu1 %vm538_vm1, %v2131_v44  ;;  %v533_v50 = vld [vmem:[%s2118_s18 + $0x41] sm:$0xff]  ;;  %v534_v52 = vld [vmem:[%s2118_s18 + $0x51] sm:$0xff]  ;;  %s1670_s14 = sshll.u32 %s2275_s20, 6 }
  0x37   : > { %1772 = vmatprep.mubr.msk.f32.mxu0 %vm538_vm1, %v951_v45  ;;  %v953_v51 = vld [vmem:[%s2121_s9 + $0x41] sm:$0xff]  ;;  %1753 = vmatprep.subr.mxu1 %v1613_v46  ;;  %v954_v53 = vld [vmem:[%s2121_s9 + $0x51] sm:$0xff]  ;;  %s2228_s25 = scalar_lea.vmem %s2266_s5, %s1670_s14 }
  0x38   : > { %1795 = vmatprep.subr.msk.mxu0 %vm563_vm0, %v1657_v47  ;;  %1731 = vmatmul.mubr.msk.f32.gmra.mrb[2].mxu1 %vm538_vm1, %v532_v48  ;;  %v535_v54 = vld [vmem:[%s2118_s18 + $0x61] sm:$0xff]  ;;  %v536_v56 = vld [vmem:[%s2118_s18 + $0x71] sm:$0xff] }
  0x39   : > { %1773 = vmatmul.mubr.msk.f32.gmra.mrb[2].mxu0 %vm538_vm1, %v952_v49  ;;  %1733 = vmatprep.mubr.msk.f32.mxu1 %vm538_vm1, %v533_v50  ;;  %v955_v55 = vld [vmem:[%s2121_s9 + $0x61] sm:$0xff]  ;;  %v956_v57 = vld [vmem:[%s2121_s9 + $0x71] sm:$0xff] }
  0x3a   : > { %1775 = vmatprep.mubr.msk.f32.mxu0 %vm538_vm1, %v953_v51  ;;  %v520_v58 = vld [vmem:[%s2118_s18] sm:$0xff]  ;;  %v1632_v59 = vld [vmem:[%s2118_s18 + $0x10] sm:$0xff] }
  0x3b   : > { %v1633_v60 = vld [vmem:[%s2118_s18 + $0x20] sm:$0xff]  ;;  %v1634_v61 = vld [vmem:[%s2118_s18 + $0x30] sm:$0xff] }
  0x3c   : > { %1734 = vmatmul.mubr.msk.f32.gmra.mrb[4].mxu1 %vm538_vm1, %v534_v52  ;;  %v1635_v62 = vld [vmem:[%s2118_s18 + $0x40] sm:$0xff]  ;;  %v1636_v63 = vld [vmem:[%s2118_s18 + $0x50] sm:$0xff] }
  0x3d   : > { %1776 = vmatmul.mubr.msk.f32.gmra.mrb[4].mxu0 %vm538_vm1, %v954_v53  ;;  %1736 = vmatprep.mubr.msk.f32.mxu1 %vm538_vm1, %v535_v54  ;;  %v1637_v0 = vld [vmem:[%s2118_s18 + $0x60] sm:$0xff]  ;;  %v1638_v1 = vld [vmem:[%s2118_s18 + $0x70] sm:$0xff] }
  0x3e   : > { %1778 = vmatprep.mubr.msk.f32.mxu0 %vm538_vm1, %v955_v55  ;;  %v1639_v2 = vld [vmem:[%s2118_s18 + $0x80] sm:$0xff]  ;;  %v803_v4 = vld [vmem:[%s2121_s9 + $0x10] sm:$0xff] }
  0x3f   : > { %v802_v3 = vld [vmem:[%s2121_s9] sm:$0xff]  ;;  %v805_v6 = vld [vmem:[%s2121_s9 + $0x30] sm:$0xff] }
  0x40   : > { %1737 = vmatmul.mubr.msk.f32.gmra.mrb[6].mxu1 %vm538_vm1, %v536_v56  ;;  %v804_v5 = vld [vmem:[%s2121_s9 + $0x20] sm:$0xff]  ;;  %v807_v8 = vld [vmem:[%s2121_s9 + $0x50] sm:$0xff] }
  0x41   : > { %1779 = vmatmul.mubr.msk.f32.gmra.mrb[6].mxu0 %vm538_vm1, %v956_v57  ;;  %1741 = vmatprep.mubr.msk.f32.mxu1 %vm672_vm2, %v520_v58  ;;  %v806_v7 = vld [vmem:[%s2121_s9 + $0x40] sm:$0xff]  ;;  %v809_v10 = vld [vmem:[%s2121_s9 + $0x70] sm:$0xff] }
  0x42   : > { %1783 = vmatprep.mubr.msk.f32.mxu0 %vm672_vm2, %v1632_v59  ;;  %v808_v9 = vld [vmem:[%s2121_s9 + $0x60] sm:$0xff] }
  0x43   : > { %v1656_v11 = vld [vmem:[%s2118_s18 + $0x81] sm:$0xff] }
  0x44   : > { %1742 = vmatmul.mubr.msk.f32.vlgmr.msra.gmra.mrb[0].mxu1 %vm672_vm2, %v1632_v59 }
  0x45   : > { %1784 = vmatmul.mubr.msk.f32.vlgmr.msra.gmra.mrb[0].mxu0 %vm672_vm2, %v1633_v60  ;;  %1754 = vmatpush3.msra.mxu1 %v1613_v46 }
  0x46   : > { %1796 = vmatpush3.msk.msra.mxu0 %vm563_vm0, %v1657_v47  ;;  %1744 = vmatprep.mubr.msk.f32.mxu1 %vm672_vm2, %v1633_v60 }
  0x47   : > { %1786 = vmatprep.mubr.msk.f32.mxu0 %vm672_vm2, %v1634_v61 }
  0x48   : > { %1745 = vmatmul.mubr.msk.f32.gmra.mrb[2].mxu1 %vm672_vm2, %v1634_v61 }
  0x49   : > { %1787 = vmatmul.mubr.msk.f32.gmra.mrb[2].mxu0 %vm672_vm2, %v1635_v62  ;;  %1747 = vmatprep.mubr.msk.f32.mxu1 %vm672_vm2, %v1635_v62 }
  0x4a   : > { %1789 = vmatprep.mubr.msk.f32.mxu0 %vm672_vm2, %v1636_v63 }
  0x4c   : > { %1748 = vmatmul.mubr.msk.f32.gmra.mrb[4].mxu1 %vm672_vm2, %v1636_v63 }
  0x4d   : > { %1790 = vmatmul.mubr.msk.f32.gmra.mrb[4].mxu0 %vm672_vm2, %v1637_v0  ;;  %1750 = vmatprep.mubr.msk.f32.mxu1 %vm672_vm2, %v1637_v0 }
  0x4e   : > { %1792 = vmatprep.mubr.msk.f32.mxu0 %vm672_vm2, %v1638_v1 }
  0x50   : > { %1751 = vmatmul.mubr.msk.f32.gmra.mrb[6].mxu1 %vm672_vm2, %v1638_v1 }
  0x51   : > { %1793 = vmatmul.mubr.msk.f32.gmra.mrb[6].mxu0 %vm672_vm2, %v1639_v2  ;;  %1755 = vmatprep.mubr.msk.f32.mxu1 %vm672_vm2, %v802_v3 }
  0x52   : > { %1797 = vmatprep.mubr.msk.f32.mxu0 %vm538_vm1, %v2125_v42 }
  0x54   : > { %1756 = vmatmul.mubr.msk.f32.vlgmr.msra.gmra.mrb[0].mxu1 %vm672_vm2, %v803_v4 }
  0x55   : > { %1798 = vmatmul.mubr.msk.f32.vlgmr.msra.gmra.mrb[0].mxu0 %vm538_vm1, %v2131_v44  ;;  %1758 = vmatprep.mubr.msk.f32.mxu1 %vm672_vm2, %v804_v5 }
  0x56   : > { %1800 = vmatprep.mubr.msk.f32.mxu0 %vm538_vm1, %v532_v48 }
  0x58   : > { %1759 = vmatmul.mubr.msk.f32.gmra.mrb[2].mxu1 %vm672_vm2, %v805_v6 }
  0x59   : > { %1801 = vmatmul.mubr.msk.f32.gmra.mrb[2].mxu0 %vm538_vm1, %v533_v50  ;;  %1761 = vmatprep.mubr.msk.f32.mxu1 %vm672_vm2, %v806_v7 }
  0x5a   : > { %1803 = vmatprep.mubr.msk.f32.mxu0 %vm538_vm1, %v534_v52 }
  0x5c   : > { %1762 = vmatmul.mubr.msk.f32.gmra.mrb[4].mxu1 %vm672_vm2, %v807_v8 }
  0x5d   : > { %1804 = vmatmul.mubr.msk.f32.gmra.mrb[4].mxu0 %vm538_vm1, %v535_v54  ;;  %1764 = vmatprep.mubr.msk.f32.mxu1 %vm672_vm2, %v808_v9 }
  0x5e   : > { %1806 = vmatprep.mubr.msk.f32.mxu0 %vm538_vm1, %v536_v56 }
  0x60   : > { %1765 = vmatmul.mubr.msk.f32.gmra.mrb[6].mxu1 %vm672_vm2, %v809_v10 }
  0x61   : > { %1807 = vmatmul.mubr.msk.f32.gmra.mrb[6].mxu0 %vm538_vm1, %v1656_v11 }
 0x127   : > { %v1757_v12 = vpop.f32.mrb[0].mxu1 }
 0x128   : > { %v1799_v13 = vpop.f32.mrb[0].mxu0  ;;  %v902_v16 = vpop.f32.mrb[1].mxu1 }
 0x129   : > { %v1809_v15 = vadd.f32 %v1799_v13, %v1757_v12  ;;  %v1350_v17 = vpop.f32.mrb[1].mxu0 }
 0x12a   : > { %v1810_v18 = vadd.f32 %v1350_v17, %v902_v16 }
 0x12b   : > { %v1405_v19 = vadd.f32 %v1809_v15, %v1667_v14  ;;  %v1760_v21 = vpop.f32.mrb[2].mxu1 }
 0x12c   : > { %v1404_v20 = vadd.f32 %v1810_v18, %v1667_v14  ;;  %v1802_v22 = vpop.f32.mrb[2].mxu0  ;;  %v912_v24 = vpop.f32.mrb[3].mxu1 }
 0x12d   : > { %1413 = vst.msk [vmem:[%s2228_s25 + $0x8] sm:$0xff] %vm538_vm1, %v1405_v19  ;;  %v1811_v23 = vadd.f32 %v1802_v22, %v1760_v21  ;;  %v1360_v25 = vpop.f32.mrb[3].mxu0 }
 0x12e   : > { %1412 = vst.msk [vmem:[%s2228_s25] sm:$0xff] %vm538_vm1, %v1404_v20  ;;  %v1812_v26 = vadd.f32 %v1360_v25, %v912_v24 }
 0x12f   : > { %v1407_v27 = vadd.f32 %v1811_v23, %v1667_v14  ;;  %v1763_v29 = vpop.f32.mrb[4].mxu1 }
 0x130   : > { %v1406_v28 = vadd.f32 %v1812_v26, %v1667_v14  ;;  %v1805_v30 = vpop.f32.mrb[4].mxu0  ;;  %v922_v32 = vpop.f32.mrb[5].mxu1 }
 0x131   : > { %1415 = vst.msk [vmem:[%s2228_s25 + $0x18] sm:$0xff] %vm538_vm1, %v1407_v27  ;;  %v1813_v31 = vadd.f32 %v1805_v30, %v1763_v29  ;;  %v1370_v33 = vpop.f32.mrb[5].mxu0 }
 0x132   : > { %1414 = vst.msk [vmem:[%s2228_s25 + $0x10] sm:$0xff] %vm538_vm1, %v1406_v28  ;;  %v1814_v34 = vadd.f32 %v1370_v33, %v922_v32 }
 0x133   : > { %v1409_v35 = vadd.f32 %v1813_v31, %v1667_v14  ;;  %v1766_v37 = vpop.f32.mrb[6].mxu1 }
 0x134   : > { %v1408_v36 = vadd.f32 %v1814_v34, %v1667_v14  ;;  %v1808_v38 = vpop.f32.mrb[6].mxu0  ;;  %v932_v40 = vpop.f32.mrb[7].mxu1 }
 0x135   : > { %1417 = vst.msk [vmem:[%s2228_s25 + $0x28] sm:$0xff] %vm538_vm1, %v1409_v35  ;;  %v1815_v39 = vadd.f32 %v1808_v38, %v1766_v37  ;;  %v1380_v41 = vpop.f32.mrb[7].mxu0 }
 0x136   : > { %1416 = vst.msk [vmem:[%s2228_s25 + $0x20] sm:$0xff] %vm538_vm1, %v1408_v36  ;;  %v1816_v42 = vadd.f32 %v1380_v41, %v932_v40 }
 0x137   : > { %v1411_v43 = vadd.f32 %v1815_v39, %v1667_v14 }
 0x138   : > { %v1410_v44 = vadd.f32 %v1816_v42, %v1667_v14 }
 0x139   : > { %1419 = vst.msk [vmem:[%s2228_s25 + $0x38] sm:$0xff] %vm538_vm1, %v1411_v43 }
 0x13a   : > { %1418 = vst.msk [vmem:[%s2228_s25 + $0x30] sm:$0xff] %vm538_vm1, %v1410_v44 }
 0x13b PF: > { %s15_s22 = sadd.s32 1, %s1931_s22   ;;  %s2268_s18 = smov %s1919_s19 }
 0x13c   : > { %p12_p10 = scmp.ge.s32.totalorder %s15_s22, 4   ;;  %s2269_s19 = smov %s2002_s27 }
 0x13d   : > { %s2270_s20 = smov %s1927_s21  ;;  %s2271_s21 = smov %s2273_s23 }
 0x13e   :  { %14 = sbr.rel (!%p12_p10) target bundleno = 3 (0x3), region = 173 }

// kernel: tpu_custom_call.1
= control target key start
LH: loop header
LB: loop body
LE: loop exit
PB: predicated region body
PF: predicated region fallthrough
CT: control target
= control target key end

     0   :  { %s1963_s18 = smov 0   ;;  %s1965_s19 = smov 0   ;;  %s2261_s0 = inlined_call_operand.vmem [shape: f32[2,9,2,9,8], index: 0, kind: input, shape index: {}]   ;;  %s2262_s1 = inlined_call_operand.vmem [shape: f32[2,9,2,9,8], index: 1, kind: input, shape index: {}]   ;;  %s2263_s2 = inlined_call_operand.vmem [shape: f32[3,8,4], index: 2, kind: input, shape index: {}]   ;;  %s2264_s3 = inlined_call_operand.vmem [shape: f32[3,4,4], index: 3, kind: input, shape index: {}]   ;;  %s2265_s4 = inlined_call_operand.vmem [shape: f32[1,4], index: 4, kind: input, shape index: {}]   ;;  %s2266_s5 = inlined_call_operand.vmem [shape: f32[2,8,8,4], index: 5, kind: output, shape index: {}]  }
   0x1   :  { %s1967_s20 = smov 0   ;;  %s1969_s21 = smov 0  }
   0x2   :  { %s1971_s22 = smov 0  }
   0x3 LB: > { %s27_s23 = sadd.s32 1, %s1927_s21  ;;  %p41_p1 = scmp.ne.s32.totalorder %s1919_s19, %s1915_s18  ;;  %s1931_s22 = sphi %s1971_s22, %s15_s22   ;;  %s1927_s21 = sphi %s1969_s21, %s2271_s21   ;;  %s1923_s20 = sphi %s1967_s20, %s2270_s20   ;;  %s1919_s19 = sphi %s1965_s19, %s2269_s19   ;;  %s1915_s18 = sphi %s1963_s18, %s2268_s18  }
   0x4   : > { %p29_p0 = scmp.ge.s32.totalorder %s27_s23, 2  ;;  %p42_p2 = scmp.eq.s32.totalorder %s1931_s22, 0 }
   0x5   : > { %s34_s26 = sadd.s32 1, %s1919_s19  ;;  %p1572_p5 = scmp.ge.s32.totalorder %s1931_s22, 2 }
   0x6   : > { %s2273_s23 = smov (%p29_p0, %s27_s23), 0  ;;  %p1994_p3 = por %p42_p2, %p41_p1 }
   0x7   : > { %s31_s25 = ssub.s32 %s1927_s21, %s2273_s23  ;;  %219 = sbr.rel (%p1572_p5) target bundleno = 42 (0x2a), region = 28 }
   0x8   : > { %p32_p4 = scmp.eq.s32.totalorder %s31_s25, 0 }
   0xa   : > { %s2002_s27 = scalar_select %p32_p4, %s1919_s19, %s34_s26  }
   0xe   : > { %222 = sbr.rel (!%p1994_p3) target bundleno = 28 (0x1c), region = 32  ;;  %s224_s28 = sand.u32 (%p1994_p3), 1, %s1919_s19  }
   0xf   : > { %s1850_s29 = smul.u32 (%p1994_p3), 288, %s1927_s21 }
  0x10   : > { %s1849_s30 = smul.u32 (%p1994_p3), 144, %s224_s28 }
  0x11   : > { %s2012_s8 = scalar_lea.vmem (%p1994_p3), %s2261_s0, %s1850_s29 }
  0x12   : > { %v291_v0 = vld [vmem:[%s2012_s8] sm:$0xff] (%p1994_p3)  ;;  %v293_v1 = vld [vmem:[%s2012_s8 + $0x8] sm:$0xff] (%p1994_p3)  ;;  %s2017_s9 = scalar_lea.vmem (%p1994_p3), [#allocation2], %s1849_s30 }
  0x13   : > { %v295_v2 = vld [vmem:[%s2012_s8 + $0x20] sm:$0xff] (%p1994_p3)  ;;  %292 = vst [vmem:[%s2017_s9] sm:$0xff] (%p1994_p3), %v291_v0  ;;  %294 = vst [vmem:[%s2017_s9 + $0x8] sm:$0xff] (%p1994_p3), %v293_v1  ;;  %v297_v3 = vld [vmem:[%s2012_s8 + $0x28] sm:$0xff] (%p1994_p3) }
  0x14   : > { %296 = vst [vmem:[%s2017_s9 + $0x10] sm:$0xff] (%p1994_p3), %v295_v2  ;;  %v299_v4 = vld [vmem:[%s2012_s8 + $0x40] sm:$0xff] (%p1994_p3)  ;;  %v301_v5 = vld [vmem:[%s2012_s8 + $0x48] sm:$0xff] (%p1994_p3)  ;;  %298 = vst [vmem:[%s2017_s9 + $0x18] sm:$0xff] (%p1994_p3), %v297_v3 }
  0x15   : > { %300 = vst [vmem:[%s2017_s9 + $0x20] sm:$0xff] %v299_v4  ;;  %302 = vst [vmem:[%s2017_s9 + $0x28] sm:$0xff] %v301_v5  ;;  %v303_v6 = vld [vmem:[%s2012_s8 + $0x60] sm:$0xff]  ;;  %v305_v7 = vld [vmem:[%s2012_s8 + $0x68] sm:$0xff] }
  0x16   : > { %v307_v8 = vld [vmem:[%s2012_s8 + $0x80] sm:$0xff]  ;;  %304 = vst [vmem:[%s2017_s9 + $0x30] sm:$0xff] %v303_v6  ;;  %306 = vst [vmem:[%s2017_s9 + $0x38] sm:$0xff] %v305_v7  ;;  %v309_v9 = vld [vmem:[%s2012_s8 + $0x88] sm:$0xff] }
  0x17   : > { %308 = vst [vmem:[%s2017_s9 + $0x40] sm:$0xff] %v307_v8  ;;  %v311_v10 = vld [vmem:[%s2012_s8 + $0xa0] sm:$0xff]  ;;  %v313_v11 = vld [vmem:[%s2012_s8 + $0xa8] sm:$0xff]  ;;  %310 = vst [vmem:[%s2017_s9 + $0x48] sm:$0xff] %v309_v9 }
  0x18   : > { %312 = vst [vmem:[%s2017_s9 + $0x50] sm:$0xff] %v311_v10  ;;  %314 = vst [vmem:[%s2017_s9 + $0x58] sm:$0xff] %v313_v11  ;;  %v315_v12 = vld [vmem:[%s2012_s8 + $0xc0] sm:$0xff]  ;;  %v317_v13 = vld [vmem:[%s2012_s8 + $0xc8] sm:$0xff] }
  0x19   : > { %v319_v14 = vld [vmem:[%s2012_s8 + $0xe0] sm:$0xff]  ;;  %316 = vst [vmem:[%s2017_s9 + $0x60] sm:$0xff] %v315_v12  ;;  %318 = vst [vmem:[%s2017_s9 + $0x68] sm:$0xff] %v317_v13  ;;  %v321_v15 = vld [vmem:[%s2012_s8 + $0xe8] sm:$0xff] }
  0x1a   : > { %320 = vst [vmem:[%s2017_s9 + $0x70] sm:$0xff] %v319_v14  ;;  %v323_v16 = vld [vmem:[%s2012_s8 + $0x100] sm:$0xff]  ;;  %v325_v17 = vld [vmem:[%s2012_s8 + $0x108] sm:$0xff]  ;;  %322 = vst [vmem:[%s2017_s9 + $0x78] sm:$0xff] %v321_v15 }
  0x1b   : > { %324 = vst [vmem:[%s2017_s9 + $0x80] sm:$0xff] %v323_v16  ;;  %326 = vst [vmem:[%s2017_s9 + $0x88] sm:$0xff] %v325_v17 }
  0x1c PF: > { %332 = sbr.rel (!%p1994_p3) target bundleno = 42 (0x2a), region = 70  ;;  %s334_s10 = sand.u32 (%p1994_p3), 1, %s1919_s19  }
  0x1d   : > { %s1574_s11 = smul.u32 (%p1994_p3), 288, %s1927_s21 }
  0x1e   : > { %s1851_s12 = smul.u32 (%p1994_p3), 144, %s334_s10 }
  0x1f   : > { %s2059_s15 = scalar_lea.vmem (%p1994_p3), %s2262_s1, %s1574_s11 }
  0x20   : > { %v1575_v18 = vld [vmem:[%s2059_s15 + $0x10] sm:$0xff] (%p1994_p3)  ;;  %v1576_v19 = vld [vmem:[%s2059_s15 + $0x18] sm:$0xff] (%p1994_p3)  ;;  %s2064_s16 = scalar_lea.vmem (%p1994_p3), [#allocation3], %s1851_s12 }
  0x21   : > { %v1577_v20 = vld [vmem:[%s2059_s15 + $0x30] sm:$0xff] (%p1994_p3)  ;;  %403 = vst [vmem:[%s2064_s16] sm:$0xff] (%p1994_p3), %v1575_v18  ;;  %405 = vst [vmem:[%s2064_s16 + $0x8] sm:$0xff] (%p1994_p3), %v1576_v19  ;;  %v1578_v21 = vld [vmem:[%s2059_s15 + $0x38] sm:$0xff] (%p1994_p3) }
  0x22   : > { %407 = vst [vmem:[%s2064_s16 + $0x10] sm:$0xff] (%p1994_p3), %v1577_v20  ;;  %v1579_v22 = vld [vmem:[%s2059_s15 + $0x50] sm:$0xff] (%p1994_p3)  ;;  %v1580_v23 = vld [vmem:[%s2059_s15 + $0x58] sm:$0xff] (%p1994_p3)  ;;  %409 = vst [vmem:[%s2064_s16 + $0x18] sm:$0xff] (%p1994_p3), %v1578_v21 }
  0x23   : > { %411 = vst [vmem:[%s2064_s16 + $0x20] sm:$0xff] %v1579_v22  ;;  %413 = vst [vmem:[%s2064_s16 + $0x28] sm:$0xff] %v1580_v23  ;;  %v1581_v24 = vld [vmem:[%s2059_s15 + $0x70] sm:$0xff]  ;;  %v1582_v25 = vld [vmem:[%s2059_s15 + $0x78] sm:$0xff] }
  0x24   : > { %v1583_v26 = vld [vmem:[%s2059_s15 + $0x90] sm:$0xff]  ;;  %415 = vst [vmem:[%s2064_s16 + $0x30] sm:$0xff] %v1581_v24  ;;  %417 = vst [vmem:[%s2064_s16 + $0x38] sm:$0xff] %v1582_v25  ;;  %v1584_v27 = vld [vmem:[%s2059_s15 + $0x98] sm:$0xff] }
  0x25   : > { %419 = vst [vmem:[%s2064_s16 + $0x40] sm:$0xff] %v1583_v26  ;;  %v1585_v28 = vld [vmem:[%s2059_s15 + $0xb0] sm:$0xff]  ;;  %v1586_v29 = vld [vmem:[%s2059_s15 + $0xb8] sm:$0xff]  ;;  %421 = vst [vmem:[%s2064_s16 + $0x48] sm:$0xff] %v1584_v27 }
  0x26   : > { %423 = vst [vmem:[%s2064_s16 + $0x50] sm:$0xff] %v1585_v28  ;;  %425 = vst [vmem:[%s2064_s16 + $0x58] sm:$0xff] %v1586_v29  ;;  %v1587_v30 = vld [vmem:[%s2059_s15 + $0xd0] sm:$0xff]  ;;  %v1588_v31 = vld [vmem:[%s2059_s15 + $0xd8] sm:$0xff] }
  0x27   : > { %v1589_v32 = vld [vmem:[%s2059_s15 + $0xf0] sm:$0xff]  ;;  %427 = vst [vmem:[%s2064_s16 + $0x60] sm:$0xff] %v1587_v30  ;;  %429 = vst [vmem:[%s2064_s16 + $0x68] sm:$0xff] %v1588_v31  ;;  %v1590_v33 = vld [vmem:[%s2059_s15 + $0xf8] sm:$0xff] }
  0x28   : > { %431 = vst [vmem:[%s2064_s16 + $0x70] sm:$0xff] %v1589_v32  ;;  %v1591_v34 = vld [vmem:[%s2059_s15 + $0x110] sm:$0xff]  ;;  %v1592_v35 = vld [vmem:[%s2059_s15 + $0x118] sm:$0xff]  ;;  %433 = vst [vmem:[%s2064_s16 + $0x78] sm:$0xff] %v1590_v33 }
  0x29   : > { %435 = vst [vmem:[%s2064_s16 + $0x80] sm:$0xff] %v1591_v34  ;;  %437 = vst [vmem:[%s2064_s16 + $0x88] sm:$0xff] %v1592_v35 }
  0x2a PF: > { %p1593_p6 = scmp.ge.s32.totalorder %s1931_s22, 1  ;;  %p442_p7 = scmp.lt.s32.totalorder %s1931_s22, 3 }
  0x2c   : > { %p443_p8 = pnand %p1593_p6, %p442_p7 }
  0x2d   : > { %v537_v36 = vld [vmem:[%s2264_s3] sm:$0xf] (!%p443_p8)  ;;  %vm563_vm0 = vcmask (!%p443_p8), 1043456   ;;  %v1622_v37 = vld [vmem:[%s2264_s3 + $0x4] sm:$0xf] (!%p443_p8)  ;;  %s449_s28 = sand.u32 (!%p443_p8), 1, %s1915_s18  }
  0x2e   : > { %446 = sbr.rel (%p443_p8) target bundleno = 315 (0x13b), region = 108  ;;  %1725 = vmatprep.subr.msk.mxu1 (!%p443_p8), %vm563_vm0, %v537_v36  ;;  %1767 = vmatprep.subr.msk.mxu0 (!%p443_p8), %vm563_vm0, %v1622_v37  ;;  %v528_v38 = vld [vmem:[%s2263_s2] sm:$0xff] (!%p443_p8)  ;;  %v1640_v39 = vld [vmem:[%s2263_s2 + $0x10] sm:$0xff] (!%p443_p8)  ;;  %vm538_vm1 = vcmask (!%p443_p8), 31744   ;;  %v1613_v46 = vld [vmem:[%s2263_s2 + $0x8] sm:$0xff] (!%p443_p8)  ;;  %vm672_vm2 = vcmask (!%p443_p8), 64512  }
  0x2f   : > { %s1852_s29 = smul.u32 (!%p443_p8), 144, %s449_s28  ;;  %1726 = vmatpush3.msk.msra.mxu1 (!%p443_p8), %vm563_vm0, %v537_v36  ;;  %1768 = vmatpush3.msk.msra.mxu0 (!%p443_p8), %vm563_vm0, %v1622_v37  ;;  %v1657_v47 = vld [vmem:[%s2264_s3 + $0x8] sm:$0xf] (!%p443_p8)  ;;  %p512_p9 = scmp.lt.s32.totalorder (!%p443_p8), %s1923_s20, 1  ;;  %v1667_v14 = vld [vmem:[%s2265_s4] ss:$0 sm:$0xff] (!%p443_p8) }
  0x30   : > { %1739 = vmatprep.subr.mxu1 (!%p443_p8), %v528_v38  ;;  %1781 = vmatprep.subr.mxu0 (!%p443_p8), %v1640_v39 }
  0x31   : > { %s2118_s18 = scalar_lea.vmem (!%p443_p8), [#allocation2], %s1852_s29  ;;  %s2121_s9 = scalar_lea.vmem (!%p443_p8), [#allocation3], %s1852_s29 }
  0x32   : > { %v529_v40 = vld [vmem:[%s2118_s18 + $0x1] sm:$0xff] (!%p443_p8)  ;;  %v2125_v42 = vld [vmem:[%s2118_s18 + $0x11] sm:$0xff] (!%p443_p8) }
  0x33   : > { %v949_v41 = vld [vmem:[%s2121_s9 + $0x1] sm:$0xff] (!%p443_p8)  ;;  %1727 = vmatprep.mubr.msk.f32.mxu1 (!%p443_p8), %vm538_vm1, %v529_v40  ;;  %v950_v43 = vld [vmem:[%s2121_s9 + $0x11] sm:$0xff] (!%p443_p8) }
  0x34   : > { %1769 = vmatprep.mubr.msk.f32.mxu0 (!%p443_p8), %vm538_vm1, %v949_v41  ;;  %v2131_v44 = vld [vmem:[%s2118_s18 + $0x21] sm:$0xff] (!%p443_p8)  ;;  %1728 = vmatmul.mubr.msk.f32.vlgmr.msra.gmra.mrb[0].mxu1 (!%p443_p8), %vm538_vm1, %v2125_v42  ;;  %v532_v48 = vld [vmem:[%s2118_s18 + $0x31] sm:$0xff] (!%p443_p8) }
  0x35   : > { %v951_v45 = vld [vmem:[%s2121_s9 + $0x21] sm:$0xff]  ;;  %1770 = vmatmul.mubr.msk.f32.vlgmr.msra.gmra.mrb[0].mxu0 %vm538_vm1, %v950_v43  ;;  %1740 = vmatpush3.msra.mxu1 %v528_v38  ;;  %v952_v49 = vld [vmem:[%s2121_s9 + $0x31] sm:$0xff]  ;;  %s2275_s20 = smov (!%p512_p9, %s1923_s20), 1 }
  0x36   : > { %1782 = vmatpush3.msra.mxu0 %v1640_v39  ;;  %1730 = vmatprep.mubr.msk.f32.mxu1 %vm538_vm1, %v2131_v44  ;;  %v533_v50 = vld [vmem:[%s2118_s18 + $0x41] sm:$0xff]  ;;  %v534_v52 = vld [vmem:[%s2118_s18 + $0x51] sm:$0xff]  ;;  %s1670_s14 = sshll.u32 %s2275_s20, 6 }
  0x37   : > { %1772 = vmatprep.mubr.msk.f32.mxu0 %vm538_vm1, %v951_v45  ;;  %v953_v51 = vld [vmem:[%s2121_s9 + $0x41] sm:$0xff]  ;;  %1753 = vmatprep.subr.mxu1 %v1613_v46  ;;  %v954_v53 = vld [vmem:[%s2121_s9 + $0x51] sm:$0xff]  ;;  %s2228_s25 = scalar_lea.vmem %s2266_s5, %s1670_s14 }
  0x38   : > { %1795 = vmatprep.subr.msk.mxu0 %vm563_vm0, %v1657_v47  ;;  %1731 = vmatmul.mubr.msk.f32.gmra.mrb[2].mxu1 %vm538_vm1, %v532_v48  ;;  %v535_v54 = vld [vmem:[%s2118_s18 + $0x61] sm:$0xff]  ;;  %v536_v56 = vld [vmem:[%s2118_s18 + $0x71] sm:$0xff] }
  0x39   : > { %1773 = vmatmul.mubr.msk.f32.gmra.mrb[2].mxu0 %vm538_vm1, %v952_v49  ;;  %1733 = vmatprep.mubr.msk.f32.mxu1 %vm538_vm1, %v533_v50  ;;  %v955_v55 = vld [vmem:[%s2121_s9 + $0x61] sm:$0xff]  ;;  %v956_v57 = vld [vmem:[%s2121_s9 + $0x71] sm:$0xff] }
  0x3a   : > { %1775 = vmatprep.mubr.msk.f32.mxu0 %vm538_vm1, %v953_v51  ;;  %v520_v58 = vld [vmem:[%s2118_s18] sm:$0xff]  ;;  %v1632_v59 = vld [vmem:[%s2118_s18 + $0x10] sm:$0xff] }
  0x3b   : > { %v1633_v60 = vld [vmem:[%s2118_s18 + $0x20] sm:$0xff]  ;;  %v1634_v61 = vld [vmem:[%s2118_s18 + $0x30] sm:$0xff] }
  0x3c   : > { %1734 = vmatmul.mubr.msk.f32.gmra.mrb[4].mxu1 %vm538_vm1, %v534_v52  ;;  %v1635_v62 = vld [vmem:[%s2118_s18 + $0x40] sm:$0xff]  ;;  %v1636_v63 = vld [vmem:[%s2118_s18 + $0x50] sm:$0xff] }
  0x3d   : > { %1776 = vmatmul.mubr.msk.f32.gmra.mrb[4].mxu0 %vm538_vm1, %v954_v53  ;;  %1736 = vmatprep.mubr.msk.f32.mxu1 %vm538_vm1, %v535_v54  ;;  %v1637_v0 = vld [vmem:[%s2118_s18 + $0x60] sm:$0xff]  ;;  %v1638_v1 = vld [vmem:[%s2118_s18 + $0x70] sm:$0xff] }
  0x3e   : > { %1778 = vmatprep.mubr.msk.f32.mxu0 %vm538_vm1, %v955_v55  ;;  %v1639_v2 = vld [vmem:[%s2118_s18 + $0x80] sm:$0xff]  ;;  %v803_v4 = vld [vmem:[%s2121_s9 + $0x10] sm:$0xff] }
  0x3f   : > { %v802_v3 = vld [vmem:[%s2121_s9] sm:$0xff]  ;;  %v805_v6 = vld [vmem:[%s2121_s9 + $0x30] sm:$0xff] }
  0x40   : > { %1737 = vmatmul.mubr.msk.f32.gmra.mrb[6].mxu1 %vm538_vm1, %v536_v56  ;;  %v804_v5 = vld [vmem:[%s2121_s9 + $0x20] sm:$0xff]  ;;  %v807_v8 = vld [vmem:[%s2121_s9 + $0x50] sm:$0xff] }
  0x41   : > { %1779 = vmatmul.mubr.msk.f32.gmra.mrb[6].mxu0 %vm538_vm1, %v956_v57  ;;  %1741 = vmatprep.mubr.msk.f32.mxu1 %vm672_vm2, %v520_v58  ;;  %v806_v7 = vld [vmem:[%s2121_s9 + $0x40] sm:$0xff]  ;;  %v809_v10 = vld [vmem:[%s2121_s9 + $0x70] sm:$0xff] }
  0x42   : > { %1783 = vmatprep.mubr.msk.f32.mxu0 %vm672_vm2, %v1632_v59  ;;  %v808_v9 = vld [vmem:[%s2121_s9 + $0x60] sm:$0xff] }
  0x43   : > { %v1656_v11 = vld [vmem:[%s2118_s18 + $0x81] sm:$0xff] }
  0x44   : > { %1742 = vmatmul.mubr.msk.f32.vlgmr.msra.gmra.mrb[0].mxu1 %vm672_vm2, %v1632_v59 }
  0x45   : > { %1784 = vmatmul.mubr.msk.f32.vlgmr.msra.gmra.mrb[0].mxu0 %vm672_vm2, %v1633_v60  ;;  %1754 = vmatpush3.msra.mxu1 %v1613_v46 }
  0x46   : > { %1796 = vmatpush3.msk.msra.mxu0 %vm563_vm0, %v1657_v47  ;;  %1744 = vmatprep.mubr.msk.f32.mxu1 %vm672_vm2, %v1633_v60 }
  0x47   : > { %1786 = vmatprep.mubr.msk.f32.mxu0 %vm672_vm2, %v1634_v61 }
  0x48   : > { %1745 = vmatmul.mubr.msk.f32.gmra.mrb[2].mxu1 %vm672_vm2, %v1634_v61 }
  0x49   : > { %1787 = vmatmul.mubr.msk.f32.gmra.mrb[2].mxu0 %vm672_vm2, %v1635_v62  ;;  %1747 = vmatprep.mubr.msk.f32.mxu1 %vm672_vm2, %v1635_v62 }
  0x4a   : > { %1789 = vmatprep.mubr.msk.f32.mxu0 %vm672_vm2, %v1636_v63 }
  0x4c   : > { %1748 = vmatmul.mubr.msk.f32.gmra.mrb[4].mxu1 %vm672_vm2, %v1636_v63 }
  0x4d   : > { %1790 = vmatmul.mubr.msk.f32.gmra.mrb[4].mxu0 %vm672_vm2, %v1637_v0  ;;  %1750 = vmatprep.mubr.msk.f32.mxu1 %vm672_vm2, %v1637_v0 }
  0x4e   : > { %1792 = vmatprep.mubr.msk.f32.mxu0 %vm672_vm2, %v1638_v1 }
  0x50   : > { %1751 = vmatmul.mubr.msk.f32.gmra.mrb[6].mxu1 %vm672_vm2, %v1638_v1 }
  0x51   : > { %1793 = vmatmul.mubr.msk.f32.gmra.mrb[6].mxu0 %vm672_vm2, %v1639_v2  ;;  %1755 = vmatprep.mubr.msk.f32.mxu1 %vm672_vm2, %v802_v3 }
  0x52   : > { %1797 = vmatprep.mubr.msk.f32.mxu0 %vm538_vm1, %v2125_v42 }
  0x54   : > { %1756 = vmatmul.mubr.msk.f32.vlgmr.msra.gmra.mrb[0].mxu1 %vm672_vm2, %v803_v4 }
  0x55   : > { %1798 = vmatmul.mubr.msk.f32.vlgmr.msra.gmra.mrb[0].mxu0 %vm538_vm1, %v2131_v44  ;;  %1758 = vmatprep.mubr.msk.f32.mxu1 %vm672_vm2, %v804_v5 }
  0x56   : > { %1800 = vmatprep.mubr.msk.f32.mxu0 %vm538_vm1, %v532_v48 }
  0x58   : > { %1759 = vmatmul.mubr.msk.f32.gmra.mrb[2].mxu1 %vm672_vm2, %v805_v6 }
  0x59   : > { %1801 = vmatmul.mubr.msk.f32.gmra.mrb[2].mxu0 %vm538_vm1, %v533_v50  ;;  %1761 = vmatprep.mubr.msk.f32.mxu1 %vm672_vm2, %v806_v7 }
  0x5a   : > { %1803 = vmatprep.mubr.msk.f32.mxu0 %vm538_vm1, %v534_v52 }
  0x5c   : > { %1762 = vmatmul.mubr.msk.f32.gmra.mrb[4].mxu1 %vm672_vm2, %v807_v8 }
  0x5d   : > { %1804 = vmatmul.mubr.msk.f32.gmra.mrb[4].mxu0 %vm538_vm1, %v535_v54  ;;  %1764 = vmatprep.mubr.msk.f32.mxu1 %vm672_vm2, %v808_v9 }
  0x5e   : > { %1806 = vmatprep.mubr.msk.f32.mxu0 %vm538_vm1, %v536_v56 }
  0x60   : > { %1765 = vmatmul.mubr.msk.f32.gmra.mrb[6].mxu1 %vm672_vm2, %v809_v10 }
  0x61   : > { %1807 = vmatmul.mubr.msk.f32.gmra.mrb[6].mxu0 %vm538_vm1, %v1656_v11 }
 0x127   : > { %v1757_v12 = vpop.f32.mrb[0].mxu1 }
 0x128   : > { %v1799_v13 = vpop.f32.mrb[0].mxu0  ;;  %v902_v16 = vpop.f32.mrb[1].mxu1 }
 0x129   : > { %v1809_v15 = vadd.f32 %v1799_v13, %v1757_v12  ;;  %v1350_v17 = vpop.f32.mrb[1].mxu0 }
 0x12a   : > { %v1810_v18 = vadd.f32 %v1350_v17, %v902_v16 }
 0x12b   : > { %v1405_v19 = vadd.f32 %v1809_v15, %v1667_v14  ;;  %v1760_v21 = vpop.f32.mrb[2].mxu1 }
 0x12c   : > { %v1404_v20 = vadd.f32 %v1810_v18, %v1667_v14  ;;  %v1802_v22 = vpop.f32.mrb[2].mxu0  ;;  %v912_v24 = vpop.f32.mrb[3].mxu1 }
 0x12d   : > { %1413 = vst.msk [vmem:[%s2228_s25 + $0x8] sm:$0xff] %vm538_vm1, %v1405_v19  ;;  %v1811_v23 = vadd.f32 %v1802_v22, %v1760_v21  ;;  %v1360_v25 = vpop.f32.mrb[3].mxu0 }
 0x12e   : > { %1412 = vst.msk [vmem:[%s2228_s25] sm:$0xff] %vm538_vm1, %v1404_v20  ;;  %v1812_v26 = vadd.f32 %v1360_v25, %v912_v24 }
 0x12f   : > { %v1407_v27 = vadd.f32 %v1811_v23, %v1667_v14  ;;  %v1763_v29 = vpop.f32.mrb[4].mxu1 }
 0x130   : > { %v1406_v28 = vadd.f32 %v1812_v26, %v1667_v14  ;;  %v1805_v30 = vpop.f32.mrb[4].mxu0  ;;  %v922_v32 = vpop.f32.mrb[5].mxu1 }
 0x131   : > { %1415 = vst.msk [vmem:[%s2228_s25 + $0x18] sm:$0xff] %vm538_vm1, %v1407_v27  ;;  %v1813_v31 = vadd.f32 %v1805_v30, %v1763_v29  ;;  %v1370_v33 = vpop.f32.mrb[5].mxu0 }
 0x132   : > { %1414 = vst.msk [vmem:[%s2228_s25 + $0x10] sm:$0xff] %vm538_vm1, %v1406_v28  ;;  %v1814_v34 = vadd.f32 %v1370_v33, %v922_v32 }
 0x133   : > { %v1409_v35 = vadd.f32 %v1813_v31, %v1667_v14  ;;  %v1766_v37 = vpop.f32.mrb[6].mxu1 }
 0x134   : > { %v1408_v36 = vadd.f32 %v1814_v34, %v1667_v14  ;;  %v1808_v38 = vpop.f32.mrb[6].mxu0  ;;  %v932_v40 = vpop.f32.mrb[7].mxu1 }
 0x135   : > { %1417 = vst.msk [vmem:[%s2228_s25 + $0x28] sm:$0xff] %vm538_vm1, %v1409_v35  ;;  %v1815_v39 = vadd.f32 %v1808_v38, %v1766_v37  ;;  %v1380_v41 = vpop.f32.mrb[7].mxu0 }
 0x136   : > { %1416 = vst.msk [vmem:[%s2228_s25 + $0x20] sm:$0xff] %vm538_vm1, %v1408_v36  ;;  %v1816_v42 = vadd.f32 %v1380_v41, %v932_v40 }
 0x137   : > { %v1411_v43 = vadd.f32 %v1815_v39, %v1667_v14 }
 0x138   : > { %v1410_v44 = vadd.f32 %v1816_v42, %v1667_v14 }
 0x139   : > { %1419 = vst.msk [vmem:[%s2228_s25 + $0x38] sm:$0xff] %vm538_vm1, %v1411_v43 }
 0x13a   : > { %1418 = vst.msk [vmem:[%s2228_s25 + $0x30] sm:$0xff] %vm538_vm1, %v1410_v44 }
 0x13b PF: > { %s15_s22 = sadd.s32 1, %s1931_s22   ;;  %s2268_s18 = smov %s1919_s19 }
 0x13c   : > { %p12_p10 = scmp.ge.s32.totalorder %s15_s22, 4   ;;  %s2269_s19 = smov %s2002_s27 }
 0x13d   : > { %s2270_s20 = smov %s1927_s21  ;;  %s2271_s21 = smov %s2273_s23 }
 0x13e   :  { %14 = sbr.rel (!%p12_p10) target bundleno = 3 (0x3), region = 173 }

</bundles_post_ra>
